<compile_context>
chip_gen: v5e
topology: v5e:2x2
jax: 0.10.0
libtpu: 0.0.40
codegen_flags: <defaults>
</compile_context>

<pallas_src>
import functools

import jax
import jax.numpy as jnp
from jax.experimental import pallas as pl
from jax.experimental.pallas import tpu as pltpu


def _mha_flash_kernel(q_ref, k_ref, v_ref, kvmask_ref,
                      wq_ref, wk_ref, wv_ref, wo_ref, bo_ref,
                      o_ref,
                      qh_sc, kh_sc, vh_sc, ctx_sc, m_sc, l_sc, acc_sc,
                      *, n_head, head_size, causal, q_block, kv_block):
    H, hs = n_head, head_size
    ki = pl.program_id(2)
    nk = pl.num_programs(2)
    neg = jnp.float32(-1e30)      # finite "masked" bias: no NaN on fully-masked rows
    scale = jnp.float32(1.0 / (head_size ** 0.5))

    # ---- init (once per (batch, q-block)): project Q, reset online-softmax state ----
    @pl.when(ki == 0)
    def _init():
        q_proj = jnp.dot(q_ref[0], wq_ref[...],
                         preferred_element_type=jnp.float32) * scale      # (tq, C)
        for h in range(H):            # layout-only copies into head-major scratch
            qh_sc[h] = q_proj[:, h * hs:(h + 1) * hs].astype(jnp.bfloat16)
        m_sc[...] = jnp.full_like(m_sc, neg)
        l_sc[...] = jnp.zeros_like(l_sc)
        acc_sc[...] = jnp.zeros_like(acc_sc)

    # ---- project the current K/V block: two full-width MXU matmuls ----
    k_proj = jnp.dot(k_ref[0], wk_ref[...], preferred_element_type=jnp.float32)
    v_proj = jnp.dot(v_ref[0], wv_ref[...], preferred_element_type=jnp.float32)
    for h in range(H):                # layout-only copies (no per-head matmuls)
        sl = slice(h * hs, (h + 1) * hs)
        kh_sc[h] = k_proj[:, sl].astype(jnp.bfloat16)
        vh_sc[h] = v_proj[:, sl].astype(jnp.bfloat16)

    # ---- scores for all heads in one batched contraction: (H, tq, tkv) ----
    s = jnp.einsum('hqd,hkd->hqk', qh_sc[...], kh_sc[...],
                   preferred_element_type=jnp.float32)

    # ---- one additive mask bias per step (key padding [+ causal]) ----
    kv_ok = kvmask_ref[0] != 0                                   # (1, tkv) bool
    allowed = jnp.broadcast_to(kv_ok, (q_block, kv_block))
    if causal:
        row = pl.program_id(1) * q_block + jax.lax.broadcasted_iota(
            jnp.int32, (q_block, kv_block), 0)
        col = ki * kv_block + jax.lax.broadcasted_iota(
            jnp.int32, (q_block, kv_block), 1)
        allowed = jnp.logical_and(allowed, col <= row)
    bias = jnp.where(allowed, jnp.float32(0.0), neg)             # (tq, tkv)
    s = s + bias[None, :, :]

    # ---- online softmax update (f32) ----
    m_prev = m_sc[...]
    m_new = jnp.maximum(m_prev, jnp.max(s, axis=-1, keepdims=True))   # (H, tq, 1)
    alpha = jnp.exp(m_prev - m_new)
    p = jnp.exp(s - m_new)                                            # (H, tq, tkv)
    l_sc[...] = alpha * l_sc[...] + jnp.sum(p, axis=-1, keepdims=True)
    acc_sc[...] = alpha * acc_sc[...] + jnp.einsum(
        'hqk,hkd->hqd', p.astype(jnp.bfloat16), vh_sc[...],
        preferred_element_type=jnp.float32)
    m_sc[...] = m_new

    # ---- finalize (last kv block): normalize, merge heads, output projection ----
    @pl.when(ki == nk - 1)
    def _finalize():
        inv_l = pl.reciprocal(l_sc[...], approx=True)                 # EUP reciprocal
        ctx = acc_sc[...] * inv_l                                     # (H, tq, hs)
        for h in range(H):            # layout-only writes into a lane-dense (tq, C) slab
            ctx_sc[:, h * hs:(h + 1) * hs] = ctx[h].astype(jnp.bfloat16)
        out = jnp.dot(ctx_sc[...], wo_ref[...],
                      preferred_element_type=jnp.float32) + bo_ref[...]
        o_ref[0] = out.astype(o_ref.dtype)
        # TODO(synk): training-mode dropout on the attention weights would use
        # pltpu.prng_seed / pltpu.prng_random_bits; the inference forward is a no-op.


def multi_head_attention(query, key, value, key_valid,
                         wq_t, wk_t, wv_t, wo_t, bo,
                         *, n_head, causal_mask,
                         q_block=None, kv_block=None):
    """MultiHeadAttention.forward.

    query: (B, T, C); key/value: (B, Tk, C); key_valid: (B, Tk), nonzero = attend
    (the `x != pad_token_id` padding mask of GPT.forward; the decoder's tril mask is
    expressed with causal_mask=True). wq_t/wk_t/wv_t/wo_t are the pre-transposed
    (in, out) Linear weights, bo is the out_proj bias with shape (1, C).
    """
    B, T, C = query.shape
    Tk = key.shape[1]
    assert C % n_head == 0, "n_embd must be divisible by n_head"
    hs = C // n_head

    if q_block is None:
        q_block = T if T <= 128 else 128
    if kv_block is None:
        kv_block = Tk if Tk <= 128 else 128
    assert T % q_block == 0 and (q_block % 8 == 0 or q_block == T)
    assert Tk % kv_block == 0 and (kv_block % 8 == 0 or kv_block == Tk)
    # the key-validity BlockSpec uses kv_block as its lane dim:
    assert kv_block == Tk or kv_block % 128 == 0

    bf16 = jnp.bfloat16
    query, key, value = (a.astype(bf16) for a in (query, key, value))
    wq_t, wk_t, wv_t, wo_t = (w.astype(bf16) for w in (wq_t, wk_t, wv_t, wo_t))
    bo = bo.astype(jnp.float32).reshape(1, C)
    key_valid = key_valid.astype(jnp.int32).reshape(B, 1, Tk)

    kernel = functools.partial(
        _mha_flash_kernel, n_head=n_head, head_size=hs,
        causal=bool(causal_mask), q_block=q_block, kv_block=kv_block)

    grid = (B, T // q_block, Tk // kv_block)
    return pl.pallas_call(
        kernel,
        out_shape=jax.ShapeDtypeStruct((B, T, C), jnp.float32),
        grid=grid,
        in_specs=[
            pl.BlockSpec((1, q_block, C), lambda b, qi, ki: (b, qi, 0)),    # query
            pl.BlockSpec((1, kv_block, C), lambda b, qi, ki: (b, ki, 0)),   # key
            pl.BlockSpec((1, kv_block, C), lambda b, qi, ki: (b, ki, 0)),   # value
            pl.BlockSpec((1, 1, kv_block), lambda b, qi, ki: (b, 0, ki)),   # key_valid
            pl.BlockSpec((C, C), lambda b, qi, ki: (0, 0)),                 # wq_t
            pl.BlockSpec((C, C), lambda b, qi, ki: (0, 0)),                 # wk_t
            pl.BlockSpec((C, C), lambda b, qi, ki: (0, 0)),                 # wv_t
            pl.BlockSpec((C, C), lambda b, qi, ki: (0, 0)),                 # wo_t
            pl.BlockSpec((1, C), lambda b, qi, ki: (0, 0)),                 # bo
        ],
        out_specs=pl.BlockSpec((1, q_block, C), lambda b, qi, ki: (b, qi, 0)),
        scratch_shapes=[
            pltpu.VMEM((n_head, q_block, hs), jnp.bfloat16),   # Q (head-major, pre-scaled)
            pltpu.VMEM((n_head, kv_block, hs), jnp.bfloat16),  # K (head-major)
            pltpu.VMEM((n_head, kv_block, hs), jnp.bfloat16),  # V (head-major)
            pltpu.VMEM((q_block, C), jnp.bfloat16),            # merged-head context
            pltpu.VMEM((n_head, q_block, 1), jnp.float32),     # running max
            pltpu.VMEM((n_head, q_block, 1), jnp.float32),     # running denominator
            pltpu.VMEM((n_head, q_block, hs), jnp.float32),    # running numerator
        ],
        compiler_params=pltpu.CompilerParams(
            dimension_semantics=("parallel", "parallel", "arbitrary"),
            vmem_limit_bytes=48 * 1024 * 1024),
    )(query, key, value, key_valid, wq_t, wk_t, wv_t, wo_t, bo)


def mha_reference(query, key, value, key_valid,
                  wq_t, wk_t, wv_t, wo_t, bo, *, n_head, causal_mask):
    """Pure-JAX f32 reference mirroring the PyTorch forward.  Masking uses the same
    finite -1e30 convention as the kernel (identical to -inf except on fully masked
    rows, where PyTorch would produce NaN)."""
    f32 = jnp.float32
    B, T, C = query.shape
    Tk = key.shape[1]
    hs = C // n_head
    q = (query.astype(f32) @ wq_t.astype(f32)).reshape(B, T, n_head, hs).transpose(0, 2, 1, 3)
    k = (key.astype(f32) @ wk_t.astype(f32)).reshape(B, Tk, n_head, hs).transpose(0, 2, 1, 3)
    v = (value.astype(f32) @ wv_t.astype(f32)).reshape(B, Tk, n_head, hs).transpose(0, 2, 1, 3)
    scores = jnp.einsum("bhqd,bhkd->bhqk", q, k) / (hs ** 0.5)
    valid = (key_valid != 0).reshape(B, 1, 1, Tk)
    if causal_mask:
        valid = jnp.logical_and(valid, jnp.tril(jnp.ones((T, Tk), bool))[None, None])
    scores = jnp.where(valid, scores, -1e30)
    attn = jax.nn.softmax(scores, axis=-1)
    out = jnp.einsum("bhqk,bhkd->bhqd", attn, v)
    out = out.transpose(0, 2, 1, 3).reshape(B, T, C)
    return out @ wo_t.astype(f32) + bo.astype(f32).reshape(1, 1, C)


if __name__ == "__main__":
    B, n_head = 2, 4
    C = 128      # n_embd: lane-dense (multiple of 128) per TPU layout guidance
    T = 16       # decoder / query length
    Tk = 256     # encoder / key length for the cross-attention test (2 kv blocks)

    keys = jax.random.split(jax.random.PRNGKey(0), 8)
    bound = 1.0 / (C ** 0.5)
    wq_t = jax.random.uniform(keys[0], (C, C), jnp.float32, -bound, bound)
    wk_t = jax.random.uniform(keys[1], (C, C), jnp.float32, -bound, bound)
    wv_t = jax.random.uniform(keys[2], (C, C), jnp.float32, -bound, bound)
    wo_t = jax.random.uniform(keys[3], (C, C), jnp.float32, -bound, bound)
    bo = jax.random.uniform(keys[4], (1, C), jnp.float32, -bound, bound)
    # Use bf16 parameters/activations for both kernel and reference (reference upcasts).
    wq_t, wk_t, wv_t, wo_t = (w.astype(jnp.bfloat16) for w in (wq_t, wk_t, wv_t, wo_t))

    x = jax.random.normal(keys[5], (B, T, C), jnp.float32).astype(jnp.bfloat16)
    q2 = jax.random.normal(keys[6], (B, T, C), jnp.float32).astype(jnp.bfloat16)
    kv2 = jax.random.normal(keys[7], (B, Tk, C), jnp.float32).astype(jnp.bfloat16)

    # ---- decoder-style causal self-attention (2 q-blocks per batch element) ----
    kv_valid_self = jnp.ones((B, T), jnp.int32)
    out1 = multi_head_attention(x, x, x, kv_valid_self,
                                wq_t, wk_t, wv_t, wo_t, bo,
                                n_head=n_head, causal_mask=True, q_block=8)
    out1 = jax.block_until_ready(out1)
    ref1 = mha_reference(x, x, x, kv_valid_self, wq_t, wk_t, wv_t, wo_t, bo,
                         n_head=n_head, causal_mask=True)
    assert out1.shape == (B, T, C)
    assert jnp.allclose(out1, ref1, atol=2e-2, rtol=2e-2), "causal self-attention mismatch"

    # ---- encoder/decoder cross-attention with key padding (2 streamed kv blocks) ----
    kv_valid_cross = jnp.ones((B, Tk), jnp.int32)
    kv_valid_cross = kv_valid_cross.at[0, 100:].set(0)   # pads tail of block 0 + all of block 1
    kv_valid_cross = kv_valid_cross.at[1, -5:].set(0)
    out2 = multi_head_attention(q2, kv2, kv2, kv_valid_cross,
                                wq_t, wk_t, wv_t, wo_t, bo,
                                n_head=n_head, causal_mask=False, kv_block=128)
    out2 = jax.block_until_ready(out2)
    ref2 = mha_reference(q2, kv2, kv2, kv_valid_cross, wq_t, wk_t, wv_t, wo_t, bo,
                         n_head=n_head, causal_mask=False)
    assert out2.shape == (B, T, C)
    assert jnp.allclose(out2, ref2, atol=2e-2, rtol=2e-2), "cross-attention mismatch"

    print("KERNEL_OK")
</pallas_src>

<mosaic_0001>
module attributes {stable_mosaic.version = 11 : i64} {
  func.func @_mha_flash_kernel(%arg0: i32, %arg1: i32, %arg2: i32, %arg3: memref<1x8x128xbf16, #tpu.memory_space<vmem>>, %arg4: memref<1x16x128xbf16, #tpu.memory_space<vmem>>, %arg5: memref<1x16x128xbf16, #tpu.memory_space<vmem>>, %arg6: memref<1x1x16xi32, #tpu.memory_space<vmem>>, %arg7: memref<128x128xbf16, #tpu.memory_space<vmem>>, %arg8: memref<128x128xbf16, #tpu.memory_space<vmem>>, %arg9: memref<128x128xbf16, #tpu.memory_space<vmem>>, %arg10: memref<128x128xbf16, #tpu.memory_space<vmem>>, %arg11: memref<1x128xf32, #tpu.memory_space<vmem>>, %arg12: memref<1x8x128xf32, #tpu.memory_space<vmem>>, %arg13: memref<4x8x32xbf16, #tpu.memory_space<vmem>>, %arg14: memref<4x16x32xbf16, #tpu.memory_space<vmem>>, %arg15: memref<4x16x32xbf16, #tpu.memory_space<vmem>>, %arg16: memref<8x128xbf16, #tpu.memory_space<vmem>>, %arg17: memref<4x8x1xf32, #tpu.memory_space<vmem>>, %arg18: memref<4x8x1xf32, #tpu.memory_space<vmem>>, %arg19: memref<4x8x32xf32, #tpu.memory_space<vmem>>) attributes {dimension_semantics = [#tpu.dimension_semantics<parallel>, #tpu.dimension_semantics<parallel>, #tpu.dimension_semantics<arbitrary>], iteration_bounds = array<i64: 2, 2, 1>, scalar_prefetch = 0 : i64, scratch_operands = 7 : i64, tpu.core_type = #tpu.core_type<tc>, window_params = [{transform_indices = @transform_0, window_bounds = array<i64: 1, 8, 128>}, {transform_indices = @transform_1, window_bounds = array<i64: 1, 16, 128>}, {transform_indices = @transform_2, window_bounds = array<i64: 1, 16, 128>}, {transform_indices = @transform_3, window_bounds = array<i64: 1, 1, 16>}, {pipeline_mode = #tpu.pipeline_mode<synchronous>, transform_indices = @transform_4, window_bounds = array<i64: 128, 128>}, {pipeline_mode = #tpu.pipeline_mode<synchronous>, transform_indices = @transform_5, window_bounds = array<i64: 128, 128>}, {pipeline_mode = #tpu.pipeline_mode<synchronous>, transform_indices = @transform_6, window_bounds = array<i64: 128, 128>}, {pipeline_mode = #tpu.pipeline_mode<synchronous>, transform_indices = @transform_7, window_bounds = array<i64: 128, 128>}, {pipeline_mode = #tpu.pipeline_mode<synchronous>, transform_indices = @transform_8, window_bounds = array<i64: 1, 128>}, {transform_indices = @transform_9, window_bounds = array<i64: 1, 8, 128>}]} {
    %c0_i32 = arith.constant 0 : i32
    %0 = arith.cmpi eq, %arg2, %c0_i32 : i32
    %1 = arith.extui %0 : i1 to i32
    %cst = arith.constant 0.176776692 : f32
    %cst_0 = arith.constant -1.000000e+30 : f32
    %c0_i32_1 = arith.constant 0 : i32
    %2 = arith.cmpi ne, %1, %c0_i32_1 : i32
    scf.if %2 {
      %c0_73 = arith.constant 0 : index
      %c0_74 = arith.constant 0 : index
      %c0_75 = arith.constant 0 : index
      %103 = vector.load %arg3[%c0_73, %c0_74, %c0_75] : memref<1x8x128xbf16, #tpu.memory_space<vmem>>, vector<1x8x128xbf16>
      %104 = vector.shape_cast %103 : vector<1x8x128xbf16> to vector<8x128xbf16>
      %c0_76 = arith.constant 0 : index
      %c0_77 = arith.constant 0 : index
      %105 = vector.load %arg7[%c0_76, %c0_77] : memref<128x128xbf16, #tpu.memory_space<vmem>>, vector<128x128xbf16>
      %cst_78 = arith.constant dense<0.000000e+00> : vector<8x128xf32>
      %106 = tpu.matmul %104, %105, %cst_78 {dimension_numbers = #tpu.dot_dimension_numbers<[1], [0], [0], [1], [0, 0, 1, 1], [], []>} : vector<8x128xbf16>, vector<128x128xbf16>, vector<8x128xf32> -> vector<8x128xf32>
      %107 = vector.broadcast %cst : f32 to vector<8x128xf32>
      %108 = arith.mulf %106, %107 : vector<8x128xf32>
      %109 = vector.extract_strided_slice %108 {offsets = [0, 0], sizes = [8, 32], strides = [1, 1]} : vector<8x128xf32> to vector<8x32xf32>
      %110 = arith.truncf %109 : vector<8x32xf32> to vector<8x32xbf16>
      %c0_79 = arith.constant 0 : index
      %c0_80 = arith.constant 0 : index
      %c0_81 = arith.constant 0 : index
      %111 = vector.load %arg13[%c0_79, %c0_80, %c0_81] : memref<4x8x32xbf16, #tpu.memory_space<vmem>>, vector<1x8x32xbf16>
      %112 = vector.shape_cast %111 : vector<1x8x32xbf16> to vector<8x32xbf16>
      %113 = vector.shape_cast %110 : vector<8x32xbf16> to vector<1x8x32xbf16>
      tpu.vector_store %arg13[%c0_79, %c0_80, %c0_81], %113 {strides = array<i32>} : memref<4x8x32xbf16, #tpu.memory_space<vmem>>, vector<1x8x32xbf16>,
      %114 = vector.extract_strided_slice %108 {offsets = [0, 32], sizes = [8, 32], strides = [1, 1]} : vector<8x128xf32> to vector<8x32xf32>
      %115 = arith.truncf %114 : vector<8x32xf32> to vector<8x32xbf16>
      %c1_82 = arith.constant 1 : index
      %c0_83 = arith.constant 0 : index
      %c0_84 = arith.constant 0 : index
      %116 = vector.load %arg13[%c1_82, %c0_83, %c0_84] : memref<4x8x32xbf16, #tpu.memory_space<vmem>>, vector<1x8x32xbf16>
      %117 = vector.shape_cast %116 : vector<1x8x32xbf16> to vector<8x32xbf16>
      %118 = vector.shape_cast %115 : vector<8x32xbf16> to vector<1x8x32xbf16>
      tpu.vector_store %arg13[%c1_82, %c0_83, %c0_84], %118 {strides = array<i32>} : memref<4x8x32xbf16, #tpu.memory_space<vmem>>, vector<1x8x32xbf16>,
      %119 = vector.extract_strided_slice %108 {offsets = [0, 64], sizes = [8, 32], strides = [1, 1]} : vector<8x128xf32> to vector<8x32xf32>
      %120 = arith.truncf %119 : vector<8x32xf32> to vector<8x32xbf16>
      %c2_85 = arith.constant 2 : index
      %c0_86 = arith.constant 0 : index
      %c0_87 = arith.constant 0 : index
      %121 = vector.load %arg13[%c2_85, %c0_86, %c0_87] : memref<4x8x32xbf16, #tpu.memory_space<vmem>>, vector<1x8x32xbf16>
      %122 = vector.shape_cast %121 : vector<1x8x32xbf16> to vector<8x32xbf16>
      %123 = vector.shape_cast %120 : vector<8x32xbf16> to vector<1x8x32xbf16>
      tpu.vector_store %arg13[%c2_85, %c0_86, %c0_87], %123 {strides = array<i32>} : memref<4x8x32xbf16, #tpu.memory_space<vmem>>, vector<1x8x32xbf16>,
      %124 = vector.extract_strided_slice %108 {offsets = [0, 96], sizes = [8, 32], strides = [1, 1]} : vector<8x128xf32> to vector<8x32xf32>
      %125 = arith.truncf %124 : vector<8x32xf32> to vector<8x32xbf16>
      %c3_88 = arith.constant 3 : index
      %c0_89 = arith.constant 0 : index
      %c0_90 = arith.constant 0 : index
      %126 = vector.load %arg13[%c3_88, %c0_89, %c0_90] : memref<4x8x32xbf16, #tpu.memory_space<vmem>>, vector<1x8x32xbf16>
      %127 = vector.shape_cast %126 : vector<1x8x32xbf16> to vector<8x32xbf16>
      %128 = vector.shape_cast %125 : vector<8x32xbf16> to vector<1x8x32xbf16>
      tpu.vector_store %arg13[%c3_88, %c0_89, %c0_90], %128 {strides = array<i32>} : memref<4x8x32xbf16, #tpu.memory_space<vmem>>, vector<1x8x32xbf16>,
      %129 = vector.broadcast %cst_0 : f32 to vector<4x8x1xf32>
      %c0_91 = arith.constant 0 : index
      %c0_92 = arith.constant 0 : index
      %c0_93 = arith.constant 0 : index
      %130 = vector.load %arg17[%c0_91, %c0_92, %c0_93] : memref<4x8x1xf32, #tpu.memory_space<vmem>>, vector<4x8x1xf32>
      tpu.vector_store %arg17[%c0_91, %c0_92, %c0_93], %129 {strides = array<i32>} : memref<4x8x1xf32, #tpu.memory_space<vmem>>, vector<4x8x1xf32>,
      %cst_94 = arith.constant 0.000000e+00 : f32
      %131 = vector.broadcast %cst_94 : f32 to vector<4x8x1xf32>
      %c0_95 = arith.constant 0 : index
      %c0_96 = arith.constant 0 : index
      %c0_97 = arith.constant 0 : index
      %132 = vector.load %arg18[%c0_95, %c0_96, %c0_97] : memref<4x8x1xf32, #tpu.memory_space<vmem>>, vector<4x8x1xf32>
      tpu.vector_store %arg18[%c0_95, %c0_96, %c0_97], %131 {strides = array<i32>} : memref<4x8x1xf32, #tpu.memory_space<vmem>>, vector<4x8x1xf32>,
      %cst_98 = arith.constant 0.000000e+00 : f32
      %133 = vector.broadcast %cst_98 : f32 to vector<4x8x32xf32>
      %c0_99 = arith.constant 0 : index
      %c0_100 = arith.constant 0 : index
      %c0_101 = arith.constant 0 : index
      %134 = vector.load %arg19[%c0_99, %c0_100, %c0_101] : memref<4x8x32xf32, #tpu.memory_space<vmem>>, vector<4x8x32xf32>
      tpu.vector_store %arg19[%c0_99, %c0_100, %c0_101], %133 {strides = array<i32>} : memref<4x8x32xf32, #tpu.memory_space<vmem>>, vector<4x8x32xf32>,
    } else {
    }
    %c0 = arith.constant 0 : index
    %c0_2 = arith.constant 0 : index
    %c0_3 = arith.constant 0 : index
    %3 = vector.load %arg4[%c0, %c0_2, %c0_3] : memref<1x16x128xbf16, #tpu.memory_space<vmem>>, vector<1x16x128xbf16>
    %4 = vector.shape_cast %3 : vector<1x16x128xbf16> to vector<16x128xbf16>
    %c0_4 = arith.constant 0 : index
    %c0_5 = arith.constant 0 : index
    %5 = vector.load %arg8[%c0_4, %c0_5] : memref<128x128xbf16, #tpu.memory_space<vmem>>, vector<128x128xbf16>
    %cst_6 = arith.constant dense<0.000000e+00> : vector<16x128xf32>
    %6 = tpu.matmul %4, %5, %cst_6 {dimension_numbers = #tpu.dot_dimension_numbers<[1], [0], [0], [1], [0, 0, 1, 1], [], []>} : vector<16x128xbf16>, vector<128x128xbf16>, vector<16x128xf32> -> vector<16x128xf32>
    %c0_7 = arith.constant 0 : index
    %c0_8 = arith.constant 0 : index
    %c0_9 = arith.constant 0 : index
    %7 = vector.load %arg5[%c0_7, %c0_8, %c0_9] : memref<1x16x128xbf16, #tpu.memory_space<vmem>>, vector<1x16x128xbf16>
    %8 = vector.shape_cast %7 : vector<1x16x128xbf16> to vector<16x128xbf16>
    %c0_10 = arith.constant 0 : index
    %c0_11 = arith.constant 0 : index
    %9 = vector.load %arg9[%c0_10, %c0_11] : memref<128x128xbf16, #tpu.memory_space<vmem>>, vector<128x128xbf16>
    %cst_12 = arith.constant dense<0.000000e+00> : vector<16x128xf32>
    %10 = tpu.matmul %8, %9, %cst_12 {dimension_numbers = #tpu.dot_dimension_numbers<[1], [0], [0], [1], [0, 0, 1, 1], [], []>} : vector<16x128xbf16>, vector<128x128xbf16>, vector<16x128xf32> -> vector<16x128xf32>
    %11 = vector.extract_strided_slice %6 {offsets = [0, 0], sizes = [16, 32], strides = [1, 1]} : vector<16x128xf32> to vector<16x32xf32>
    %12 = arith.truncf %11 : vector<16x32xf32> to vector<16x32xbf16>
    %c0_13 = arith.constant 0 : index
    %c0_14 = arith.constant 0 : index
    %c0_15 = arith.constant 0 : index
    %13 = vector.load %arg14[%c0_13, %c0_14, %c0_15] : memref<4x16x32xbf16, #tpu.memory_space<vmem>>, vector<1x16x32xbf16>
    %14 = vector.shape_cast %13 : vector<1x16x32xbf16> to vector<16x32xbf16>
    %15 = vector.shape_cast %12 : vector<16x32xbf16> to vector<1x16x32xbf16>
    tpu.vector_store %arg14[%c0_13, %c0_14, %c0_15], %15 {strides = array<i32>} : memref<4x16x32xbf16, #tpu.memory_space<vmem>>, vector<1x16x32xbf16>,
    %16 = vector.extract_strided_slice %10 {offsets = [0, 0], sizes = [16, 32], strides = [1, 1]} : vector<16x128xf32> to vector<16x32xf32>
    %17 = arith.truncf %16 : vector<16x32xf32> to vector<16x32xbf16>
    %c0_16 = arith.constant 0 : index
    %c0_17 = arith.constant 0 : index
    %c0_18 = arith.constant 0 : index
    %18 = vector.load %arg15[%c0_16, %c0_17, %c0_18] : memref<4x16x32xbf16, #tpu.memory_space<vmem>>, vector<1x16x32xbf16>
    %19 = vector.shape_cast %18 : vector<1x16x32xbf16> to vector<16x32xbf16>
    %20 = vector.shape_cast %17 : vector<16x32xbf16> to vector<1x16x32xbf16>
    tpu.vector_store %arg15[%c0_16, %c0_17, %c0_18], %20 {strides = array<i32>} : memref<4x16x32xbf16, #tpu.memory_space<vmem>>, vector<1x16x32xbf16>,
    %21 = vector.extract_strided_slice %6 {offsets = [0, 32], sizes = [16, 32], strides = [1, 1]} : vector<16x128xf32> to vector<16x32xf32>
    %22 = arith.truncf %21 : vector<16x32xf32> to vector<16x32xbf16>
    %c1 = arith.constant 1 : index
    %c0_19 = arith.constant 0 : index
    %c0_20 = arith.constant 0 : index
    %23 = vector.load %arg14[%c1, %c0_19, %c0_20] : memref<4x16x32xbf16, #tpu.memory_space<vmem>>, vector<1x16x32xbf16>
    %24 = vector.shape_cast %23 : vector<1x16x32xbf16> to vector<16x32xbf16>
    %25 = vector.shape_cast %22 : vector<16x32xbf16> to vector<1x16x32xbf16>
    tpu.vector_store %arg14[%c1, %c0_19, %c0_20], %25 {strides = array<i32>} : memref<4x16x32xbf16, #tpu.memory_space<vmem>>, vector<1x16x32xbf16>,
    %26 = vector.extract_strided_slice %10 {offsets = [0, 32], sizes = [16, 32], strides = [1, 1]} : vector<16x128xf32> to vector<16x32xf32>
    %27 = arith.truncf %26 : vector<16x32xf32> to vector<16x32xbf16>
    %c1_21 = arith.constant 1 : index
    %c0_22 = arith.constant 0 : index
    %c0_23 = arith.constant 0 : index
    %28 = vector.load %arg15[%c1_21, %c0_22, %c0_23] : memref<4x16x32xbf16, #tpu.memory_space<vmem>>, vector<1x16x32xbf16>
    %29 = vector.shape_cast %28 : vector<1x16x32xbf16> to vector<16x32xbf16>
    %30 = vector.shape_cast %27 : vector<16x32xbf16> to vector<1x16x32xbf16>
    tpu.vector_store %arg15[%c1_21, %c0_22, %c0_23], %30 {strides = array<i32>} : memref<4x16x32xbf16, #tpu.memory_space<vmem>>, vector<1x16x32xbf16>,
    %31 = vector.extract_strided_slice %6 {offsets = [0, 64], sizes = [16, 32], strides = [1, 1]} : vector<16x128xf32> to vector<16x32xf32>
    %32 = arith.truncf %31 : vector<16x32xf32> to vector<16x32xbf16>
    %c2 = arith.constant 2 : index
    %c0_24 = arith.constant 0 : index
    %c0_25 = arith.constant 0 : index
    %33 = vector.load %arg14[%c2, %c0_24, %c0_25] : memref<4x16x32xbf16, #tpu.memory_space<vmem>>, vector<1x16x32xbf16>
    %34 = vector.shape_cast %33 : vector<1x16x32xbf16> to vector<16x32xbf16>
    %35 = vector.shape_cast %32 : vector<16x32xbf16> to vector<1x16x32xbf16>
    tpu.vector_store %arg14[%c2, %c0_24, %c0_25], %35 {strides = array<i32>} : memref<4x16x32xbf16, #tpu.memory_space<vmem>>, vector<1x16x32xbf16>,
    %36 = vector.extract_strided_slice %10 {offsets = [0, 64], sizes = [16, 32], strides = [1, 1]} : vector<16x128xf32> to vector<16x32xf32>
    %37 = arith.truncf %36 : vector<16x32xf32> to vector<16x32xbf16>
    %c2_26 = arith.constant 2 : index
    %c0_27 = arith.constant 0 : index
    %c0_28 = arith.constant 0 : index
    %38 = vector.load %arg15[%c2_26, %c0_27, %c0_28] : memref<4x16x32xbf16, #tpu.memory_space<vmem>>, vector<1x16x32xbf16>
    %39 = vector.shape_cast %38 : vector<1x16x32xbf16> to vector<16x32xbf16>
    %40 = vector.shape_cast %37 : vector<16x32xbf16> to vector<1x16x32xbf16>
    tpu.vector_store %arg15[%c2_26, %c0_27, %c0_28], %40 {strides = array<i32>} : memref<4x16x32xbf16, #tpu.memory_space<vmem>>, vector<1x16x32xbf16>,
    %41 = vector.extract_strided_slice %6 {offsets = [0, 96], sizes = [16, 32], strides = [1, 1]} : vector<16x128xf32> to vector<16x32xf32>
    %42 = arith.truncf %41 : vector<16x32xf32> to vector<16x32xbf16>
    %c3 = arith.constant 3 : index
    %c0_29 = arith.constant 0 : index
    %c0_30 = arith.constant 0 : index
    %43 = vector.load %arg14[%c3, %c0_29, %c0_30] : memref<4x16x32xbf16, #tpu.memory_space<vmem>>, vector<1x16x32xbf16>
    %44 = vector.shape_cast %43 : vector<1x16x32xbf16> to vector<16x32xbf16>
    %45 = vector.shape_cast %42 : vector<16x32xbf16> to vector<1x16x32xbf16>
    tpu.vector_store %arg14[%c3, %c0_29, %c0_30], %45 {strides = array<i32>} : memref<4x16x32xbf16, #tpu.memory_space<vmem>>, vector<1x16x32xbf16>,
    %46 = vector.extract_strided_slice %10 {offsets = [0, 96], sizes = [16, 32], strides = [1, 1]} : vector<16x128xf32> to vector<16x32xf32>
    %47 = arith.truncf %46 : vector<16x32xf32> to vector<16x32xbf16>
    %c3_31 = arith.constant 3 : index
    %c0_32 = arith.constant 0 : index
    %c0_33 = arith.constant 0 : index
    %48 = vector.load %arg15[%c3_31, %c0_32, %c0_33] : memref<4x16x32xbf16, #tpu.memory_space<vmem>>, vector<1x16x32xbf16>
    %49 = vector.shape_cast %48 : vector<1x16x32xbf16> to vector<16x32xbf16>
    %50 = vector.shape_cast %47 : vector<16x32xbf16> to vector<1x16x32xbf16>
    tpu.vector_store %arg15[%c3_31, %c0_32, %c0_33], %50 {strides = array<i32>} : memref<4x16x32xbf16, #tpu.memory_space<vmem>>, vector<1x16x32xbf16>,
    %c0_34 = arith.constant 0 : index
    %c0_35 = arith.constant 0 : index
    %c0_36 = arith.constant 0 : index
    %51 = vector.load %arg13[%c0_34, %c0_35, %c0_36] : memref<4x8x32xbf16, #tpu.memory_space<vmem>>, vector<4x8x32xbf16>
    %c0_37 = arith.constant 0 : index
    %c0_38 = arith.constant 0 : index
    %c0_39 = arith.constant 0 : index
    %52 = vector.load %arg14[%c0_37, %c0_38, %c0_39] : memref<4x16x32xbf16, #tpu.memory_space<vmem>>, vector<4x16x32xbf16>
    "tpu.trace_start"() <{level = 10 : i32, message = "hqd,hkd->hqk"}> : () -> ()
    %cst_40 = arith.constant dense<0.000000e+00> : vector<4x8x16xf32>
    %53 = tpu.matmul %51, %52, %cst_40 {dimension_numbers = #tpu.dot_dimension_numbers<[2], [2], [1], [1], [0, 0, 0, 1, 1, 1], [0], [0]>} : vector<4x8x32xbf16>, vector<4x16x32xbf16>, vector<4x8x16xf32> -> vector<4x8x16xf32>
    "tpu.trace_stop"() : () -> ()
    %c0_41 = arith.constant 0 : index
    %c0_42 = arith.constant 0 : index
    %c0_43 = arith.constant 0 : index
    %54 = vector.load %arg6[%c0_41, %c0_42, %c0_43] : memref<1x1x16xi32, #tpu.memory_space<vmem>>, vector<1x1x16xi32>
    %55 = vector.shape_cast %54 : vector<1x1x16xi32> to vector<1x16xi32>
    %c0_i32_44 = arith.constant 0 : i32
    %56 = vector.broadcast %c0_i32_44 : i32 to vector<1x16xi32>
    %57 = arith.cmpi ne, %55, %56 : vector<1x16xi32>
    %58 = vector.shape_cast %57 : vector<1x16xi1> to vector<1x16xi1>
    %59 = vector.broadcast %58 : vector<1x16xi1> to vector<8x16xi1>
    %c8_i32 = arith.constant 8 : i32
    %60 = arith.muli %arg1, %c8_i32 : i32
    %61 = tpu.iota {dimensions = array<i32: 0>} : vector<8x16xi32>
    %62 = vector.broadcast %60 : i32 to vector<8x16xi32>
    %63 = arith.addi %62, %61 : vector<8x16xi32>
    %c16_i32 = arith.constant 16 : i32
    %64 = arith.muli %arg2, %c16_i32 : i32
    %65 = tpu.iota {dimensions = array<i32: 1>} : vector<8x16xi32>
    %66 = vector.broadcast %64 : i32 to vector<8x16xi32>
    %67 = arith.addi %66, %65 : vector<8x16xi32>
    %68 = arith.cmpi sle, %67, %63 : vector<8x16xi32>
    %69 = arith.andi %59, %68 : vector<8x16xi1>
    %cst_45 = arith.constant 0.000000e+00 : f32
    %cst_46 = arith.constant -1.000000e+30 : f32
    %70 = vector.broadcast %cst_45 : f32 to vector<8x16xf32>
    %71 = vector.broadcast %cst_46 : f32 to vector<8x16xf32>
    %72 = arith.select %69, %70, %71 : vector<8x16xi1>, vector<8x16xf32>
    %73 = vector.shape_cast %72 : vector<8x16xf32> to vector<1x8x16xf32>
    %74 = vector.broadcast %73 : vector<1x8x16xf32> to vector<4x8x16xf32>
    %75 = arith.addf %53, %74 : vector<4x8x16xf32>
    %c0_47 = arith.constant 0 : index
    %c0_48 = arith.constant 0 : index
    %c0_49 = arith.constant 0 : index
    %76 = vector.load %arg17[%c0_47, %c0_48, %c0_49] : memref<4x8x1xf32, #tpu.memory_space<vmem>>, vector<4x8x1xf32>
    %cst_50 = arith.constant dense<0xFF800000> : vector<4x8xf32>
    %77 = vector.multi_reduction <maximumf>, %75, %cst_50 [2] : vector<4x8x16xf32> to vector<4x8xf32>
    %78 = vector.shape_cast %77 : vector<4x8xf32> to vector<4x8x1xf32>
    %79 = arith.maximumf %76, %78 : vector<4x8x1xf32>
    %80 = arith.subf %76, %79 : vector<4x8x1xf32>
    %81 = math.exp %80 : vector<4x8x1xf32>
    %82 = vector.broadcast %79 : vector<4x8x1xf32> to vector<4x8x16xf32>
    %83 = arith.subf %75, %82 : vector<4x8x16xf32>
    %84 = math.exp %83 : vector<4x8x16xf32>
    %c0_51 = arith.constant 0 : index
    %c0_52 = arith.constant 0 : index
    %c0_53 = arith.constant 0 : index
    %85 = vector.load %arg18[%c0_51, %c0_52, %c0_53] : memref<4x8x1xf32, #tpu.memory_space<vmem>>, vector<4x8x1xf32>
    %86 = arith.mulf %81, %85 : vector<4x8x1xf32>
    %cst_54 = arith.constant dense<0.000000e+00> : vector<4x8xf32>
    %87 = vector.multi_reduction <add>, %84, %cst_54 [2] : vector<4x8x16xf32> to vector<4x8xf32>
    %88 = vector.shape_cast %87 : vector<4x8xf32> to vector<4x8x1xf32>
    %89 = arith.addf %86, %88 : vector<4x8x1xf32>
    %c0_55 = arith.constant 0 : index
    %c0_56 = arith.constant 0 : index
    %c0_57 = arith.constant 0 : index
    %90 = vector.load %arg18[%c0_55, %c0_56, %c0_57] : memref<4x8x1xf32, #tpu.memory_space<vmem>>, vector<4x8x1xf32>
    tpu.vector_store %arg18[%c0_55, %c0_56, %c0_57], %89 {strides = array<i32>} : memref<4x8x1xf32, #tpu.memory_space<vmem>>, vector<4x8x1xf32>,
    %c0_58 = arith.constant 0 : index
    %c0_59 = arith.constant 0 : index
    %c0_60 = arith.constant 0 : index
    %91 = vector.load %arg19[%c0_58, %c0_59, %c0_60] : memref<4x8x32xf32, #tpu.memory_space<vmem>>, vector<4x8x32xf32>
    %92 = vector.broadcast %81 : vector<4x8x1xf32> to vector<4x8x32xf32>
    %93 = arith.mulf %92, %91 : vector<4x8x32xf32>
    %94 = arith.truncf %84 : vector<4x8x16xf32> to vector<4x8x16xbf16>
    %c0_61 = arith.constant 0 : index
    %c0_62 = arith.constant 0 : index
    %c0_63 = arith.constant 0 : index
    %95 = vector.load %arg15[%c0_61, %c0_62, %c0_63] : memref<4x16x32xbf16, #tpu.memory_space<vmem>>, vector<4x16x32xbf16>
    "tpu.trace_start"() <{level = 10 : i32, message = "hqk,hkd->hqd"}> : () -> ()
    %cst_64 = arith.constant dense<0.000000e+00> : vector<4x8x32xf32>
    %96 = tpu.matmul %94, %95, %cst_64 {dimension_numbers = #tpu.dot_dimension_numbers<[2], [1], [1], [2], [0, 0, 0, 1, 1, 2], [0], [0]>} : vector<4x8x16xbf16>, vector<4x16x32xbf16>, vector<4x8x32xf32> -> vector<4x8x32xf32>
    "tpu.trace_stop"() : () -> ()
    %97 = arith.addf %93, %96 : vector<4x8x32xf32>
    %c0_65 = arith.constant 0 : index
    %c0_66 = arith.constant 0 : index
    %c0_67 = arith.constant 0 : index
    %98 = vector.load %arg19[%c0_65, %c0_66, %c0_67] : memref<4x8x32xf32, #tpu.memory_space<vmem>>, vector<4x8x32xf32>
    tpu.vector_store %arg19[%c0_65, %c0_66, %c0_67], %97 {strides = array<i32>} : memref<4x8x32xf32, #tpu.memory_space<vmem>>, vector<4x8x32xf32>,
    %c0_68 = arith.constant 0 : index
    %c0_69 = arith.constant 0 : index
    %c0_70 = arith.constant 0 : index
    %99 = vector.load %arg17[%c0_68, %c0_69, %c0_70] : memref<4x8x1xf32, #tpu.memory_space<vmem>>, vector<4x8x1xf32>
    tpu.vector_store %arg17[%c0_68, %c0_69, %c0_70], %79 {strides = array<i32>} : memref<4x8x1xf32, #tpu.memory_space<vmem>>, vector<4x8x1xf32>,
    %c0_i32_71 = arith.constant 0 : i32
    %100 = arith.cmpi eq, %arg2, %c0_i32_71 : i32
    %101 = arith.extui %100 : i1 to i32
    %c0_i32_72 = arith.constant 0 : i32
    %102 = arith.cmpi ne, %101, %c0_i32_72 : i32
    scf.if %102 {
      %c0_73 = arith.constant 0 : index
      %c0_74 = arith.constant 0 : index
      %c0_75 = arith.constant 0 : index
      %103 = vector.load %arg18[%c0_73, %c0_74, %c0_75] : memref<4x8x1xf32, #tpu.memory_space<vmem>>, vector<4x8x1xf32>
      %104 = tpu.reciprocal %103 {approx = true} : vector<4x8x1xf32> -> vector<4x8x1xf32>
      %c0_76 = arith.constant 0 : index
      %c0_77 = arith.constant 0 : index
      %c0_78 = arith.constant 0 : index
      %105 = vector.load %arg19[%c0_76, %c0_77, %c0_78] : memref<4x8x32xf32, #tpu.memory_space<vmem>>, vector<4x8x32xf32>
      %106 = vector.broadcast %104 : vector<4x8x1xf32> to vector<4x8x32xf32>
      %107 = arith.mulf %105, %106 : vector<4x8x32xf32>
      %108 = vector.extract_strided_slice %107 {offsets = [0, 0, 0], sizes = [1, 8, 32], strides = [1, 1, 1]} : vector<4x8x32xf32> to vector<1x8x32xf32>
      %109 = vector.shape_cast %108 : vector<1x8x32xf32> to vector<8x32xf32>
      %110 = arith.truncf %109 : vector<8x32xf32> to vector<8x32xbf16>
      %c0_79 = arith.constant 0 : index
      %c0_80 = arith.constant 0 : index
      %111 = vector.load %arg16[%c0_79, %c0_80] : memref<8x128xbf16, #tpu.memory_space<vmem>>, vector<8x32xbf16>
      tpu.vector_store %arg16[%c0_79, %c0_80], %110 {strides = array<i32>} : memref<8x128xbf16, #tpu.memory_space<vmem>>, vector<8x32xbf16>,
      %112 = vector.extract_strided_slice %107 {offsets = [1, 0, 0], sizes = [1, 8, 32], strides = [1, 1, 1]} : vector<4x8x32xf32> to vector<1x8x32xf32>
      %113 = vector.shape_cast %112 : vector<1x8x32xf32> to vector<8x32xf32>
      %114 = arith.truncf %113 : vector<8x32xf32> to vector<8x32xbf16>
      %c0_81 = arith.constant 0 : index
      %c32 = arith.constant 32 : index
      %115 = vector.load %arg16[%c0_81, %c32] : memref<8x128xbf16, #tpu.memory_space<vmem>>, vector<8x32xbf16>
      tpu.vector_store %arg16[%c0_81, %c32], %114 {strides = array<i32>} : memref<8x128xbf16, #tpu.memory_space<vmem>>, vector<8x32xbf16>,
      %116 = vector.extract_strided_slice %107 {offsets = [2, 0, 0], sizes = [1, 8, 32], strides = [1, 1, 1]} : vector<4x8x32xf32> to vector<1x8x32xf32>
      %117 = vector.shape_cast %116 : vector<1x8x32xf32> to vector<8x32xf32>
      %118 = arith.truncf %117 : vector<8x32xf32> to vector<8x32xbf16>
      %c0_82 = arith.constant 0 : index
      %c64 = arith.constant 64 : index
      %119 = vector.load %arg16[%c0_82, %c64] : memref<8x128xbf16, #tpu.memory_space<vmem>>, vector<8x32xbf16>
      tpu.vector_store %arg16[%c0_82, %c64], %118 {strides = array<i32>} : memref<8x128xbf16, #tpu.memory_space<vmem>>, vector<8x32xbf16>,
      %120 = vector.extract_strided_slice %107 {offsets = [3, 0, 0], sizes = [1, 8, 32], strides = [1, 1, 1]} : vector<4x8x32xf32> to vector<1x8x32xf32>
      %121 = vector.shape_cast %120 : vector<1x8x32xf32> to vector<8x32xf32>
      %122 = arith.truncf %121 : vector<8x32xf32> to vector<8x32xbf16>
      %c0_83 = arith.constant 0 : index
      %c96 = arith.constant 96 : index
      %123 = vector.load %arg16[%c0_83, %c96] : memref<8x128xbf16, #tpu.memory_space<vmem>>, vector<8x32xbf16>
      tpu.vector_store %arg16[%c0_83, %c96], %122 {strides = array<i32>} : memref<8x128xbf16, #tpu.memory_space<vmem>>, vector<8x32xbf16>,
      %c0_84 = arith.constant 0 : index
      %c0_85 = arith.constant 0 : index
      %124 = vector.load %arg16[%c0_84, %c0_85] : memref<8x128xbf16, #tpu.memory_space<vmem>>, vector<8x128xbf16>
      %c0_86 = arith.constant 0 : index
      %c0_87 = arith.constant 0 : index
      %125 = vector.load %arg10[%c0_86, %c0_87] : memref<128x128xbf16, #tpu.memory_space<vmem>>, vector<128x128xbf16>
      %cst_88 = arith.constant dense<0.000000e+00> : vector<8x128xf32>
      %126 = tpu.matmul %124, %125, %cst_88 {dimension_numbers = #tpu.dot_dimension_numbers<[1], [0], [0], [1], [0, 0, 1, 1], [], []>} : vector<8x128xbf16>, vector<128x128xbf16>, vector<8x128xf32> -> vector<8x128xf32>
      %c0_89 = arith.constant 0 : index
      %c0_90 = arith.constant 0 : index
      %127 = vector.load %arg11[%c0_89, %c0_90] : memref<1x128xf32, #tpu.memory_space<vmem>>, vector<1x128xf32>
      %128 = vector.broadcast %127 : vector<1x128xf32> to vector<8x128xf32>
      %129 = arith.addf %126, %128 : vector<8x128xf32>
      %c0_91 = arith.constant 0 : index
      %c0_92 = arith.constant 0 : index
      %c0_93 = arith.constant 0 : index
      %130 = vector.load %arg12[%c0_91, %c0_92, %c0_93] : memref<1x8x128xf32, #tpu.memory_space<vmem>>, vector<1x8x128xf32>
      %131 = vector.shape_cast %130 : vector<1x8x128xf32> to vector<8x128xf32>
      %132 = vector.shape_cast %129 : vector<8x128xf32> to vector<1x8x128xf32>
      tpu.vector_store %arg12[%c0_91, %c0_92, %c0_93], %132 {strides = array<i32>} : memref<1x8x128xf32, #tpu.memory_space<vmem>>, vector<1x8x128xf32>,
    } else {
    }
    return
  }
  func.func @transform_0(%arg0: i32, %arg1: i32, %arg2: i32) -> (i32, i32, i32) {
    %c0_i32 = arith.constant 0 : i32
    %c0_i32_0 = arith.constant 0 : i32
    return %arg0, %arg1, %c0_i32 : i32, i32, i32
  }
  func.func @transform_1(%arg0: i32, %arg1: i32, %arg2: i32) -> (i32, i32, i32) {
    %c0_i32 = arith.constant 0 : i32
    %c0_i32_0 = arith.constant 0 : i32
    return %arg0, %arg2, %c0_i32 : i32, i32, i32
  }
  func.func @transform_2(%arg0: i32, %arg1: i32, %arg2: i32) -> (i32, i32, i32) {
    %c0_i32 = arith.constant 0 : i32
    %c0_i32_0 = arith.constant 0 : i32
    return %arg0, %arg2, %c0_i32 : i32, i32, i32
  }
  func.func @transform_3(%arg0: i32, %arg1: i32, %arg2: i32) -> (i32, i32, i32) {
    %c0_i32 = arith.constant 0 : i32
    %c0_i32_0 = arith.constant 0 : i32
    return %arg0, %c0_i32, %arg2 : i32, i32, i32
  }
  func.func @transform_4(%arg0: i32, %arg1: i32, %arg2: i32) -> (i32, i32) {
    %c0_i32 = arith.constant 0 : i32
    %c0_i32_0 = arith.constant 0 : i32
    %c0_i32_1 = arith.constant 0 : i32
    return %c0_i32, %c0_i32_0 : i32, i32
  }
  func.func @transform_5(%arg0: i32, %arg1: i32, %arg2: i32) -> (i32, i32) {
    %c0_i32 = arith.constant 0 : i32
    %c0_i32_0 = arith.constant 0 : i32
    %c0_i32_1 = arith.constant 0 : i32
    return %c0_i32, %c0_i32_0 : i32, i32
  }
  func.func @transform_6(%arg0: i32, %arg1: i32, %arg2: i32) -> (i32, i32) {
    %c0_i32 = arith.constant 0 : i32
    %c0_i32_0 = arith.constant 0 : i32
    %c0_i32_1 = arith.constant 0 : i32
    return %c0_i32, %c0_i32_0 : i32, i32
  }
  func.func @transform_7(%arg0: i32, %arg1: i32, %arg2: i32) -> (i32, i32) {
    %c0_i32 = arith.constant 0 : i32
    %c0_i32_0 = arith.constant 0 : i32
    %c0_i32_1 = arith.constant 0 : i32
    return %c0_i32, %c0_i32_0 : i32, i32
  }
  func.func @transform_8(%arg0: i32, %arg1: i32, %arg2: i32) -> (i32, i32) {
    %c0_i32 = arith.constant 0 : i32
    %c0_i32_0 = arith.constant 0 : i32
    %c0_i32_1 = arith.constant 0 : i32
    return %c0_i32, %c0_i32_0 : i32, i32
  }
  func.func @transform_9(%arg0: i32, %arg1: i32, %arg2: i32) -> (i32, i32, i32) {
    %c0_i32 = arith.constant 0 : i32
    %c0_i32_0 = arith.constant 0 : i32
    return %arg0, %arg1, %c0_i32 : i32, i32, i32
  }
}

</mosaic_0001>

<bundles_post_ra>
// kernel: tpu_custom_call.1
= control target key start
LH: loop header
LB: loop body
LE: loop exit
PB: predicated region body
PF: predicated region fallthrough
CT: control target
= control target key end

     0   :  { %s2905_s0 = inlined_call_operand.hbm [shape: bf16[2,16,128], index: 0, kind: input, shape index: {}]   ;;  %s2906_s1 = inlined_call_operand.hbm [shape: bf16[2,16,128], index: 1, kind: input, shape index: {}]   ;;  %s2907_s2 = inlined_call_operand.hbm [shape: bf16[2,16,128], index: 2, kind: input, shape index: {}]   ;;  %s2908_s3 = inlined_call_operand.vmem [shape: s32[2,1,16], index: 3, kind: input, shape index: {}]   ;;  %s2909_s4 = inlined_call_operand.hbm [shape: bf16[128,128], index: 4, kind: input, shape index: {}]   ;;  %s2910_s5 = inlined_call_operand.hbm [shape: bf16[128,128], index: 5, kind: input, shape index: {}]   ;;  %s2911_s6 = inlined_call_operand.hbm [shape: bf16[128,128], index: 6, kind: input, shape index: {}]   ;;  %s2912_s7 = inlined_call_operand.hbm [shape: bf16[128,128], index: 7, kind: input, shape index: {}]   ;;  %s2913_s8 = inlined_call_operand.vmem [shape: f32[1,128], index: 8, kind: input, shape index: {}]   ;;  %s2914_s9 = inlined_call_operand.hbm [shape: f32[2,16,128], index: 9, kind: output, shape index: {}]  }
   0x1   :  { %2934 = sst [smem:[#allocation37_spill]] %s2906_s1 }
   0x2   :  { %2935 = sst [smem:[#allocation38_spill]] %s2907_s2 }
   0x3   :  { %2936 = sst [smem:[#allocation39_spill]] %s2908_s3 }
   0x4   :  { %2937 = sst [smem:[#allocation40_spill]] %s2909_s4 }
   0x5   :  { %2938 = sst [smem:[#allocation41_spill]] %s2910_s5 }
   0x6   :  { %2939 = sst [smem:[#allocation42_spill]] %s2911_s6 }
   0x7   :  { %2940 = sst [smem:[#allocation43_spill]] %s2912_s7 }
   0x8   :  { %2941 = sst [smem:[#allocation44_spill]] %s2913_s8 }
   0x9   :  { %2942 = sst [smem:[#allocation45_spill]] %s2914_s9 }
   0xa   :  { %14 = vsyncpa [#allocation10], 0 }
   0xb   :  { %16 = vsyncpa [#allocation10 + $0x1], 0 }
   0xc   :  { %17 = vsyncpa [#allocation13], 0 }
   0xd   :  { %19 = vsyncpa [#allocation13 + $0x1], 0 }
   0xe   :  { %20 = vsyncpa [#allocation16], 0 }
   0xf   :  { %21 = vsyncpa [#allocation19], 0 }
  0x10   :  { %22 = vsyncpa [#allocation11], 0 }
  0x11   :  { %24 = vsyncpa [#allocation11 + $0x1], 0  ;;  %s2473_s30 = smov 0   ;;  %s2475_s10 = smov 0  }
  0x12   :  { %s2477_s11 = smov 0   ;;  %s2479_s12 = smov 0  }
  0x13   :  { %s2481_s13 = smov 0   ;;  %s2483_s14 = smov 0  }
  0x14   :  { %s2485_s15 = smov 0   ;;  %s2487_s16 = smov 0  }
  0x15   :  { %s2489_s17 = smov 0   ;;  %s2491_s18 = smov 0  }
  0x16   :  { %s2493_s19 = smov 0  }
  0x17 LB: > { %2943 = sst [smem:[#allocation27_spill]] %s2373_s10  ;;  %s2529_s20 = sadd.s32 4294967295, %s2409_s19   ;;  %s2409_s19 = sphi %s2493_s19, %s30_s19   ;;  %s2405_s18 = sphi %s2491_s18, %s2993_s18   ;;  %s2401_s17 = sphi %s2489_s17, %s2992_s17   ;;  %s2397_s16 = sphi %s2487_s16, %s2991_s16   ;;  %s2393_s15 = sphi %s2485_s15, %s2990_s15   ;;  %s2389_s14 = sphi %s2483_s14, %s2989_s14   ;;  %s2385_s13 = sphi %s2481_s13, %s2988_s13   ;;  %s2381_s12 = sphi %s2479_s12, %s2987_s12   ;;  %s2377_s11 = sphi %s2477_s11, %s2986_s11   ;;  %s2373_s10 = sphi %s2475_s10, %s2985_s10   ;;  %s2369_s30 = sphi %s2473_s30, %s2982_s30  }
  0x18   : > { %2944 = sst [smem:[#allocation28_spill]] %s2381_s12  ;;  %p1626_p0 = scmp.ge.s32.totalorder %s2409_s19, 1 }
  0x19   : > { %2945 = sst [smem:[#allocation29_spill]] %s2393_s15  ;;  %p72_p1 = scmp.eq.s32.totalorder %s2529_s20, 0 }
  0x1a   : > { %2946 = sst [smem:[#allocation30_spill]] %s2397_s16  ;;  %p299_p2 = scmp.lt.s32.totalorder %s2409_s19, 5 }
  0x1b   : > { %2947 = sst [smem:[#allocation31_spill]] %s2529_s20  ;;  %s2411_s25 = smov [#allocation15]  }
  0x1c   : > { %s2948_s4 = sld [smem:[#allocation40_spill]]  ;;  %p2537_p3 = pnand %p1626_p0, %p299_p2 }
  0x1d   : > { %s312_s26 = sshll.u32 %s2411_s25, 4  ;;  %s2951_s6 = sld [smem:[#allocation42_spill]]  ;;  %s313_s26 = int_to_ptr.vmem [resolvable:$true] %s312_s26 }
  0x1e   : > { %p1900_p4 = pneg %p2537_p3  ;;  %s2916_s22 = smov 64  }
  0x1f   : > { %s2918_s25 = smov 4   ;;  %p66_p6 = scmp.eq.s32.totalorder %s2409_s19, 0 }
  0x20   : > { %p2545_p5 = pnand %p1900_p4, %p72_p1  ;;  %p93_p7 = scmp.ne.s32.totalorder %s2377_s11, %s2373_s10 }
  0x21   : > { %p99_p8 = scmp.ne.s32.totalorder %s2373_s10, %s2369_s30  ;;  %p2924_p9 = scmp.lt.s32.totalorder %s2409_s19, 4 }
  0x22   : > { %s310_s23 = sshll.u32 %s2948_s4, 4  ;;  %s2414_s4 = smov [#allocation18]   ;;  %s311_s23 = int_to_ptr.hbm [resolvable:$true] %s310_s23 }
  0x23   : > { %s338_s21 = sshll.u32 %s2951_s6, 4  ;;  %s340_s8 = sshll.u32 %s2414_s4, 4  ;;  %s339_s21 = int_to_ptr.hbm [resolvable:$true] %s338_s21  ;;  %s341_s8 = int_to_ptr.vmem [resolvable:$true] %s340_s8 }
  0x24   : > { %1903 = dma.hbm_to_vmem [thread:$0]  (!%p2545_p5), %s311_s23, 1024, %s313_s26, [#allocation16], %s2916_s22, %s2916_s22, %s2918_s25  }
  0x25   : > { %1909 = dma.hbm_to_vmem [thread:$0]  (!%p2545_p5), %s339_s21, 1024, %s341_s8, [#allocation19], %s2916_s22, %s2916_s22, %s2918_s25  }
  0x26   : > { %p2571_p10 = por %p99_p8, %p72_p1  ;;  %s392_s23 = sand.u32 1, %s2409_s19  }
  0x27   : > { %p95_p11 = por %p93_p7, %p66_p6  ;;  %s394_s4 = sand.u32 1, %s2377_s11  }
  0x28   : > { %s2952_s29 = scalar_select %p2571_p10, 1, 0 }
  0x29   : > { %s1635_s26 = sshll.u32 %s394_s4, 3  ;;  %s1832_s6 = sshll.u32 %s2405_s18, 3 }
  0x2a   : > { %2953 = sst [smem:[#allocation32_spill]] %s2952_s29  ;;  %s396_s22 = scalar_lea.vmem [#allocation12], %s1635_s26 }
  0x2b   : > { %s2954_s1 = sld [smem:[#allocation37_spill]]  ;;  %s406_s30 = sshll.u32 %s396_s22, 4  ;;  %s407_s30 = int_to_ptr.vmem [resolvable:$true] %s406_s30 }
  0x2c   : > { %p2585_p12 = pnand %p2924_p9, %p95_p11  ;;  %s2956_s2 = sld [smem:[#allocation38_spill]] }
  0x2d   : > { %s2592_s29 = scalar_lea.sflag [#allocation13], %s392_s23  ;;  %s2957_s3 = smov 4  }
  0x2e   : > { %s2958_s9 = smov 64   ;;  %s420_s22 = scalar_lea.vmem [#allocation14], %s1635_s26 }
  0x2f   : > { %s2959_s5 = sld [smem:[#allocation41_spill]]  ;;  %s2415_s23 = smov [#allocation17]  }
  0x30   : > { %s2960_s7 = sld [smem:[#allocation43_spill]]  ;;  %s1625_s25 = sadd.s32 4294967294, %s2409_s19  }
  0x31   : > { %s403_s8 = scalar_lea.hbm %s2954_s1, %s1832_s6  ;;  %p65_p0 = scmp.ne.s32.totalorder %s2389_s14, %s2385_s13 }
  0x32   : > { %s404_s21 = sshll.u32 %s403_s8, 4  ;;  %s427_s4 = scalar_lea.hbm %s2956_s2, %s1832_s6  ;;  %s405_s21 = int_to_ptr.hbm [resolvable:$true] %s404_s21 }
  0x33   : > { %s428_s16 = sshll.u32 %s427_s4, 4  ;;  %s2602_s8 = sshll.u32 %s420_s22, 4  ;;  %s2600_s16 = int_to_ptr.hbm [resolvable:$true] %s428_s16  ;;  %s431_s8 = int_to_ptr.vmem [resolvable:$true] %s2602_s8 }
  0x34   : > { %1919 = dma.hbm_to_vmem [thread:$0]  (!%p2585_p12), %s405_s21, 128, %s407_s30, %s2592_s29, %s2958_s9, %s2958_s9, %s2957_s3  }
  0x35   : > { %s324_s6 = sshll.u32 %s2959_s5, 4  ;;  %s326_s4 = sshll.u32 %s2415_s23, 4  ;;  %s325_s6 = int_to_ptr.hbm [resolvable:$true] %s324_s6  ;;  %s327_s4 = int_to_ptr.vmem [resolvable:$true] %s326_s4 }
  0x36   : > { %s352_s26 = sshll.u32 %s2960_s7, 4  ;;  %s2416_s22 = smov [#allocation20]   ;;  %s353_s26 = int_to_ptr.hbm [resolvable:$true] %s352_s26 }
  0x37   : > { %1906 = dma.hbm_to_vmem [thread:$0]  (!%p2545_p5), %s325_s6, 1024, %s327_s4, [#allocation16], %s2958_s9, %s2958_s9, %s2957_s3  }
  0x38   : > { %s354_s15 = sshll.u32 %s2416_s22, 4  ;;  %s45_s23 = sadd.s32 1, %s2401_s17  ;;  %s355_s15 = int_to_ptr.vmem [resolvable:$true] %s354_s15 }
  0x39   : > { %1912 = dma.hbm_to_vmem [thread:$0]  (!%p2545_p5), %s353_s26, 1024, %s355_s15, [#allocation19], %s2958_s9, %s2958_s9, %s2957_s3  }
  0x3a   : > { %p47_p13 = scmp.ge.s32.totalorder %s45_s23, 2  ;;  %s49_s21 = sadd.s32 1, %s2405_s18 }
  0x3b   : > { %s58_s30 = sadd.s32 1, %s2389_s14  ;;  %p2633_p2 = por %p66_p6, %p65_p0 }
  0x3c   : > { %s2995_s23 = smov (%p47_p13, %s45_s23), 0  ;;  %s2997_s21 = smov (!%p47_p13, %s49_s21), %s2405_s18 }
  0x3d   : > { %2961 = sst [smem:[#allocation33_spill]] %s2995_s23  ;;  %s54_s27 = ssub.s32 %s2401_s17, %s2995_s23 }
  0x3e   : > { %p51_p4 = scmp.ge.s32.totalorder %s2997_s21, 2  ;;  %p71_p5 = scmp.ne.s32.totalorder %s2385_s13, %s2381_s12 }
  0x3f   : > { %p286_p7 = scmp.eq.s32.totalorder %s2529_s20, 3  ;;  %p292_p8 = scmp.eq.s32.totalorder %s1625_s25, 3 }
  0x40   : > { %s2999_s21 = smov (%p51_p4, %s2997_s21), 0  ;;  %p2644_p11 = por %p72_p1, %p71_p5 }
  0x41   : > { %2963 = sst [smem:[#allocation34_spill]] %s2999_s21  ;;  %p2648_p13 = por %p286_p7, %p65_p0 }
  0x42   : > { %s53_s22 = ssub.s32 %s2405_s18, %s2999_s21  ;;  %p2654_p6 = por %p292_p8, %p71_p5 }
  0x43   : > { %s2965_s26 = scalar_select %p2648_p13, 1, 0 }
  0x44   : > { %s2967_s15 = scalar_select %p2654_p6, 1, 0 }
  0x45   : > { %2966 = sst [smem:[#allocation35_spill]] %s2965_s26  ;;  %s55_s25 = sor.u32 %s54_s27, %s53_s22 }
  0x46   : > { %2968 = sst [smem:[#allocation36_spill]] %s2967_s15  ;;  %p84_p4 = scmp.eq.s32.totalorder %s53_s22, 0 }
  0x47   : > { %p56_p9 = scmp.eq.s32.totalorder %s55_s25, 0  ;;  %s371_s1 = sand.u32 1, %s2389_s14  }
  0x48   : > { %s2969_s2 = sadd.s32 1, %s2377_s11  ;;  %s1632_s21 = sshll.u32 %s371_s1, 2 }
  0x49   : > { %s2662_s5 = scalar_select %p84_p4, %s2377_s11, %s2969_s2  }
  0x4a   : > { %s2665_s7 = scalar_select %p56_p9, %s2389_s14, %s58_s30  }
  0x4b   : > { %s1633_s23 = sshll.u32 %s2405_s18, 1  ;;  %s375_s26 = scalar_lea.vmem [#allocation9], %s1632_s21 }
  0x4c   : > { %s379_s12 = sadd.s32 %s2401_s17, %s1633_s23  ;;  %s385_s10 = sshll.u32 %s375_s26, 4  ;;  %s386_s10 = int_to_ptr.vmem [resolvable:$true] %s385_s10 }
  0x4d   : > { %s1634_s20 = sshll.u32 %s379_s12, 2  ;;  %p2970_p0 = scmp.lt.s32.totalorder %s2409_s19, 4 }
  0x4e   : > { %s381_s22 = scalar_lea.hbm %s2905_s0, %s1634_s20  ;;  %s372_s25 = scalar_lea.sflag [#allocation10], %s371_s1 }
  0x4f   : > { %p1914_p5 = pnand %p2970_p0, %p2633_p2  ;;  %s383_s2 = sshll.u32 %s381_s22, 4  ;;  %s384_s2 = int_to_ptr.hbm [resolvable:$true] %s383_s2 }
  0x50   : > { %1922 = dma.hbm_to_vmem [thread:$0]  (!%p2585_p12), %s2600_s16, 128, %s431_s8, %s2592_s29, %s2958_s9, %s2958_s9, %s2957_s3  }
  0x51   : > { %1916 = dma.hbm_to_vmem [thread:$0]  (!%p1914_p5), %s384_s2, 64, %s386_s10, %s372_s25  }
  0x52   : > { %451 = sbr.rel (%p2537_p3) target bundleno = 1345 (0x541), region = 56  ;;  %s2687_s12 = sand.u32 (!%p2537_p3), 1, %s2385_s13  }
  0x53   : > { %s1642_s20 = sshll.u32 (!%p2537_p3), %s2687_s12, 2  ;;  %s454_s23 = scalar_lea.sflag (!%p2537_p3), [#allocation10], %s2687_s12 }
  0x54   : > { %s2691_s21 = scalar_lea.vmem (!%p2537_p3), [#allocation9], %s1642_s20 }
  0x57   : > { %2348 = dma.done.wait (%p2644_p11), %s454_s23, 64  }
  0x58   : > { %2350 = vsyncadd (%p2644_p11), %s454_s23, 4294967232  ;;  %s2971_s1 = sld [smem:[#allocation31_spill]] }
  0x59   : > { %s2972_s10 = sld [smem:[#allocation27_spill]] }
  0x5e   : > { %s463_s24 = sand.u32 1, %s2971_s1  }
  0x5f   : > { %s465_s28 = sand.u32 1, %s2972_s10   ;;  %s464_s3 = scalar_lea.sflag [#allocation13], %s463_s24 }
  0x60   : > { %s2699_s29 = sshll.u32 %s465_s28, 3 }
  0x61   : > { %s467_s9 = scalar_lea.vmem [#allocation12], %s2699_s29 }
  0x62   : > { %2352 = dma.done.wait (%p2571_p10), %s464_s3, 256  }
  0x63   : > { %2354 = vsyncadd (%p2571_p10), %s464_s3, 4294967040  ;;  %s477_s8 = scalar_lea.vmem [#allocation14], %s2699_s29 }
  0x64   : > { %2356 = dma.done.wait (%p72_p1), [#allocation16], 2048  }
  0x65   : > { %2358 = vsyncadd (%p72_p1), [#allocation16], 4294965248 }
  0x66   : > { %2360 = dma.done.wait (%p72_p1), [#allocation19], 2048  }
  0x67   : > { %2362 = vsyncadd (%p72_p1), [#allocation19], 4294965248  ;;  %v1841_v0 = vld [vmem:[#allocation15 + $0x38] sm:$0xff]  ;;  %v1840_v2 = vld [vmem:[#allocation15 + $0x30] sm:$0xff]  ;;  %vm642_vm0 = vcmask 257024   ;;  %s2417_s30 = smov 96   ;;  %v931_v53 = vlaneseq }
  0x68   : > { %v1850_v1 = vld [vmem:[#allocation17 + $0x38] sm:$0xff]  ;;  %627 = vmatpush.bf16.msra.mxu0 %v1841_v0  ;;  %v1849_v3 = vld [vmem:[#allocation17 + $0x30] sm:$0xff]  ;;  %v1839_v4 = vld [vmem:[#allocation15 + $0x28] sm:$0xff]  ;;  %s2418_s6 = smov 64   ;;  %vm669_vm1 = vcmask 261120   ;;  %s2419_s4 = smov 32  }
  0x69   : > { %746 = vmatpush.bf16.msra.mxu1 %v1850_v1  ;;  %v1848_v5 = vld [vmem:[#allocation17 + $0x28] sm:$0xff]  ;;  %v1838_v6 = vld [vmem:[#allocation15 + $0x20] sm:$0xff]  ;;  %v1837_v8 = vld [vmem:[#allocation15 + $0x18] sm:$0xff]  ;;  %s2974_s26 = sld [smem:[#allocation30_spill]]  ;;  %v2420_v42 = vmov 0   ;;  %v932_v56 = vshrl.u32 %v931_v53, 7 }
  0x6a   : > { %v1847_v7 = vld [vmem:[#allocation17 + $0x20] sm:$0xff]  ;;  %v1846_v9 = vld [vmem:[#allocation17 + $0x18] sm:$0xff]  ;;  %v1836_v10 = vld [vmem:[#allocation15 + $0x10] sm:$0xff]  ;;  %2037 = vset.pattern.permute.xlu0 %v2420_v42  ;;  %2038 = vset.pattern.permute.xlu1 %v2420_v42  ;;  %s2975_s15 = sld [smem:[#allocation29_spill]]  ;;  %v937_v62 = vand.u32 127, %v931_v53  ;;  %vm1044_vm6 = vcmask 130048  }
  0x6b   : > { %v1845_v11 = vld [vmem:[#allocation17 + $0x10] sm:$0xff]  ;;  %v1835_v12 = vld [vmem:[#allocation15 + $0x8] sm:$0xff]  ;;  %v1834_v14 = vld [vmem:[#allocation15] sm:$0xff]  ;;  %2039 = vset.pattern.permute.xlu2 %v2420_v42  ;;  %s2976_s25 = sld [smem:[#allocation39_spill]]  ;;  %v2421_v0 = vmov -1e+30  }
  0x6c   : > { %628 = vmatpush.bf16.msra.mxu0 %v1840_v2  ;;  %v1844_v13 = vld [vmem:[#allocation17 + $0x8] sm:$0xff]  ;;  %v1843_v15 = vld [vmem:[#allocation17] sm:$0xff]  ;;  %v562_v17 = vld [vmem:[%s2691_s21] sm:$0xf]  ;;  %vm660_vm7 = vcmask 7168   ;;  %vm1320_vm8 = vcmask 519424  }
  0x6d   : > { %747 = vmatpush.bf16.msra.mxu1 %v1849_v3  ;;  %v1842_v16 = vld [vmem:[%s467_s9] sm:$0xff]  ;;  %v1859_v29 = vld [vmem:[#allocation18 + $0x38] sm:$0xff]  ;;  %v1858_v30 = vld [vmem:[#allocation18 + $0x30] sm:$0xff]  ;;  %661 = vst.msk [vmem:[#allocation6] sm:$0xff] %vm660_vm7, %v2421_v0  ;;  %vm1327_vm9 = vcmask 781824   ;;  %vm1334_vm10 = vcmask 1044224  }
  0x6e   : > { %832 = vmatpush.bf16.msra.mxu2 %v1859_v29  ;;  %v1857_v31 = vld [vmem:[#allocation18 + $0x28] sm:$0xff]  ;;  %v1856_v33 = vld [vmem:[#allocation18 + $0x20] sm:$0xff]  ;;  %v1855_v34 = vld [vmem:[#allocation18 + $0x18] sm:$0xff]  ;;  %662 = vst.msk [vmem:[#allocation6 + $0x8] sm:$0xff] %vm660_vm7, %v2421_v0  ;;  %s1649_s16 = sshll.u32 %s2687_s12, 3  ;;  %s2977_s29 = sld [smem:[#allocation45_spill]] }
  0x6f   : > { %v1854_v36 = vld [vmem:[#allocation18 + $0x10] sm:$0xff]  ;;  %v1853_v37 = vld [vmem:[#allocation18 + $0x8] sm:$0xff]  ;;  %v1852_v41 = vld [vmem:[#allocation18] sm:$0xff]  ;;  %p551_p1 = scmp.lt.s32.totalorder %s2974_s26, 1  ;;  %663 = vst.msk [vmem:[#allocation6 + $0x10] sm:$0xff] %vm660_vm7, %v2421_v0  ;;  %s1828_s21 = sshll.u32 %s2974_s26, 1 }
  0x70   : > { %629 = vmatpush.bf16.msra.mxu0 %v1839_v4  ;;  %v1851_v43 = vld [vmem:[%s477_s8] sm:$0xff]  ;;  %s1754_s23 = sshll.u32 %s2975_s15, 3  ;;  %664 = vst.msk [vmem:[#allocation6 + $0x18] sm:$0xff] %vm660_vm7, %v2421_v0  ;;  %s1430_s1 = sadd.s32 %s2975_s15, %s1828_s21 }
  0x71   : > { %748 = vmatpush.bf16.msra.mxu1 %v1848_v5  ;;  %s552_s27 = scalar_select %p551_p1, %s2974_s26, 1  ;;  %v933_v58 = vstv %s1754_s23 }
  0x72   : > { %833 = vmatpush.bf16.msra.mxu2 %v1858_v30  ;;  %v934_v61 = vadd.s32 %v933_v58, %v932_v56  ;;  %s1829_s10 = sshll.u32 %s1430_s1, 3  ;;  %s1420_s26 = scalar_lea.sflag [#allocation11], %s2687_s12 }
  0x73   : > { %s556_s20 = scalar_lea.vmem %s2976_s25, %s552_s27 }
  0x74   : > { %630 = vmatpush.bf16.msra.mxu0 %v1838_v6  ;;  %v925_v52 = vld [vmem:[%s556_s20] sm:$0x1]  ;;  %vm940_vm4 = vcmp.le.s32.totalorder %v937_v62, %v934_v61  ;;  %s1432_s9 = scalar_lea.hbm %s2977_s29, %s1829_s10  ;;  %s2295_s23 = scalar_lea.hbm %s2977_s29, 32 }
  0x75   : > { %749 = vmatpush.bf16.msra.mxu1 %v1847_v7  ;;  %vm926_vm2 = vcmp.ne.s32.totalorder %v925_v52, 0  ;;  %v2422_v7 = vmov 0.0   ;;  %v2797_v29 = vld [vmem:[#allocation6 + $0x8] sm:$0xff]  ;;  %s1436_s22 = sshll.u32 %s1432_s9, 4  ;;  %s1437_s22 = int_to_ptr.hbm [resolvable:$true] %s1436_s22 }
  0x76   : > { %834 = vmatpush.bf16.msra.mxu2 %v1857_v31  ;;  %v927_v57 = vsel %vm926_vm2, 1, %v2420_v42  ;;  %666 = vst.msk [vmem:[#allocation7 + $0x8] sm:$0xff] %vm660_vm7, %v2422_v7  ;;  %s2289_s15 = sshra.s32 %s1437_s22, 4  ;;  %s2290_s15 = int_to_ptr.hbm [resolvable:$true] %s2289_s15 }
  0x77   : > { %v928_v60 = vperm.slane %v927_v57, 0  ;;  %665 = vst.msk [vmem:[#allocation7] sm:$0xff] %vm660_vm7, %v2422_v7  ;;  %s2291_s2 = scalar_lea.hbm %s2290_s15, 8  ;;  %p2296_p12 = scmp.lt.s32.totalorder %s2290_s15, %s2977_s29 }
  0x78   : > { %631 = vmatpush.bf16.msra.mxu0 %v1837_v8  ;;  %667 = vst.msk [vmem:[#allocation7 + $0x10] sm:$0xff] %vm660_vm7, %v2422_v7  ;;  %p2292_p3 = scmp.ne.s32.totalorder %s2290_s15, %s2291_s2  ;;  %p2297_p2 = scmp.lt.s32.totalorder %s2295_s23, %s2291_s2 }
  0x79   : > { %750 = vmatpush.bf16.msra.mxu1 %v1846_v9  ;;  %vm929_vm3 = vcmp.eq.s32.totalorder %v928_v60, 1  ;;  %668 = vst.msk [vmem:[#allocation7 + $0x18] sm:$0xff] %vm660_vm7, %v2422_v7 }
  0x7a   : > { %835 = vmatpush.bf16.msra.mxu2 %v1856_v33  ;;  %vm941_vm5 = vmand %vm929_vm3, %vm940_vm4  ;;  %670 = vst.msk [vmem:[#allocation8] sm:$0xff] %vm669_vm1, %v2422_v7  ;;  %v1043_v33 = vld [vmem:[#allocation6 + $0x18] sm:$0xff]  ;;  %p2293_p9 = pnand %p2292_p3, %p2648_p13  ;;  %p2298_p7 = por %p2297_p2, %p2296_p12 }
  0x7b   : > { %v942_v1 = vsel %vm941_vm5, 0.0, %v2421_v0  ;;  %671 = vst.msk [vmem:[#allocation8 + $0x8] sm:$0xff] %vm669_vm1, %v2422_v7 }
  0x7c   : > { %632 = vmatpush.bf16.msra.mxu0 %v1836_v10  ;;  %672 = vst.msk [vmem:[#allocation8 + $0x10] sm:$0xff] %vm669_vm1, %v2422_v7  ;;  %p2294_p10 = pneg %p2293_p9 }
  0x7d   : > { %751 = vmatpush.bf16.msra.mxu1 %v1845_v11  ;;  %673 = vst.msk [vmem:[#allocation8 + $0x18] sm:$0xff] %vm669_vm1, %v2422_v7 }
  0x7e   : > { %836 = vmatpush.bf16.msra.mxu2 %v1855_v34  ;;  %p2299_p8 = pnand %p2298_p7, %p2294_p10 }
  0x80   : > { %633 = vmatpush.bf16.msra.mxu0 %v1835_v12 }
  0x81   : > { %752 = vmatpush.bf16.msra.mxu1 %v1844_v13 }
  0x82   : > { %837 = vmatpush.bf16.msra.mxu2 %v1854_v36 }
  0x84   : > { %634 = vmatpush.bf16.msra.mxu0 %v1834_v14 }
  0x85   : > { %753 = vmatpush.bf16.msra.mxu1 %v1843_v15  ;;  %v2772_v15 = vld [vmem:[#allocation6] sm:$0xff] }
  0x86   : > { %838 = vmatpush.bf16.msra.mxu2 %v1853_v37 }
  0x87   : > { %635 = vmatmul.bf16.vlgmr.msra.gmra.mxu0 %v562_v17 }
  0x88   : > { %754 = vmatmul.bf16.vlgmr.msra.gmra.mxu1 %v1842_v16 }
  0x8a   : > { %839 = vmatpush.bf16.msra.mxu2 %v1852_v41 }
  0x8d   : > { %840 = vmatmul.bf16.vlgmr.msra.gmra.mxu2 %v1851_v43 }
 0x104   : > { %v636_v18 = vpop.f32.mrf.mxu0 }
 0x105   : > { %v755_v19 = vpop.f32.mrf.mxu1  ;;  %v640_v20 = vmul.f32 0.17677669, %v636_v18 }
 0x106   : > { %v846_v21 = vpack.c.bf16 %v755_v19, %v755_v19 }
 0x107   : > { %v641_v22 = vpack.c.bf16 %v640_v20, %v640_v20 }
 0x108   : > { %849 = vst.msk [vmem:[#allocation3] sm:$0xf] %vm642_vm0, %v846_v21  ;;  %857 = vrot.lane.b32.xlu0 %v846_v21, %s2417_s30 }
 0x109   : > { %643 = vst.msk [vmem:[#allocation2] sm:$0xf] %vm642_vm0, %v641_v22  ;;  %645 = vrot.lane.b32.xlu1 %v641_v22, %s2417_s30 }
 0x10c   : > { %v638_v23 = vpop.f32.mrf.mxu0 }
 0x10d   : > { %v757_v24 = vpop.f32.mrf.mxu1 }
 0x10e   : > { %v847_v25 = vpack.c.bf16 %v757_v24, %v757_v24 }
 0x110   : > { %850 = vst.msk [vmem:[#allocation3 + $0x4] sm:$0xf] %vm642_vm0, %v847_v25  ;;  %879 = vrot.lane.b32.xlu2 %v847_v25, %s2418_s6  ;;  %859 = vrot.lane.b32.xlu0 %v847_v25, %s2417_s30  ;;  %v913_v28 = vld [vmem:[#allocation2] sm:$0xf]  ;;  %v841_v8 = vpop.f32.mrf.mxu2 }
 0x111   : > { %877 = vrot.lane.b32.xlu1 %v846_v21, %s2418_s6  ;;  %v851_v9 = vpack.c.bf16 %v841_v8, %v841_v8 }
 0x113   : > { %853 = vst.msk [vmem:[#allocation4] sm:$0xf] %vm642_vm0, %v851_v9 }
 0x117   : > { %v1860_v26 = vld [vmem:[#allocation3] sm:$0xff] }
 0x118   : > { %895 = vrot.lane.b32.xlu0 %v846_v21, %s2419_s4  ;;  %650 = vrot.lane.b32.xlu2 %v641_v22, %s2418_s6  ;;  %v953_v27 = vsel %vm669_vm1, %v1860_v26, 0  ;;  %v843_v10 = vpop.f32.mrf.mxu2 }
 0x119   : > { %897 = vrot.lane.b32.xlu1 %v847_v25, %s2419_s4  ;;  %962 = vmatpush.bf16.xpose.msra.mxu3 %v953_v27  ;;  %v852_v11 = vpack.c.bf16 %v843_v10, %v843_v10 }
 0x11b   : > { %854 = vst.msk [vmem:[#allocation4 + $0x4] sm:$0xf] %vm642_vm0, %v852_v11 }
 0x120   : > { %655 = vrot.lane.b32.xlu2 %v641_v22, %s2419_s4  ;;  %1759 = vmatmul.msk.bf16.vlgmr.msra.gmra.mxu3 %vm669_vm1, %v913_v28 }
 0x122   : > { %v1864_v13 = vld [vmem:[#allocation4] sm:$0xff] }
 0x123   : > { %1190 = vmatpush.bf16.msrb.mxu2 %v1864_v13 }
 0x16a   : > { %v880_v32 = vpop.permute.xlu2 %879 }
 0x16b   : > { %885 = vst.msk [vmem:[#allocation3 + $0x14] sm:$0xf] %vm642_vm0, %v880_v32 }
 0x172   : > { %v651_v35 = vpop.permute.xlu2 %650 }
 0x173   : > { %654 = vst.msk [vmem:[#allocation2 + $0x8] sm:$0xf] %vm642_vm0, %v651_v35 }
 0x17a   : > { %v858_v38 = vpop.permute.xlu0 %857  ;;  %v656_v39 = vpop.permute.xlu2 %655  ;;  %v915_v2 = vld [vmem:[#allocation2 + $0x8] sm:$0xf] }
 0x17b   : > { %864 = vst.msk [vmem:[#allocation3 + $0x8] sm:$0xf] %vm642_vm0, %v858_v38  ;;  %v646_v40 = vpop.permute.xlu1 %645 }
 0x17c   : > { %659 = vst.msk [vmem:[#allocation2 + $0xc] sm:$0xf] %vm642_vm0, %v656_v39 }
 0x17d   : > { %649 = vst.msk [vmem:[#allocation2 + $0x4] sm:$0xf] %vm642_vm0, %v646_v40 }
 0x182   : > { %v860_v44 = vpop.permute.xlu0 %859 }
 0x183   : > { %865 = vst.msk [vmem:[#allocation3 + $0xc] sm:$0xf] %vm642_vm0, %v860_v44  ;;  %v878_v45 = vpop.permute.xlu1 %877  ;;  %v916_v63 = vld [vmem:[#allocation2 + $0xc] sm:$0xf] }
 0x184   : > { %884 = vst.msk [vmem:[#allocation3 + $0x10] sm:$0xf] %vm642_vm0, %v878_v45  ;;  %v914_v54 = vld [vmem:[#allocation2 + $0x4] sm:$0xf] }
 0x18a   : > { %v896_v46 = vpop.permute.xlu0 %895  ;;  %v1861_v47 = vld [vmem:[#allocation3 + $0x8] sm:$0xff] }
 0x18b   : > { %902 = vst.msk [vmem:[#allocation3 + $0x18] sm:$0xf] %vm642_vm0, %v896_v46  ;;  %v898_v48 = vpop.permute.xlu1 %897  ;;  %v977_v49 = vsel %vm669_vm1, %v1861_v47, 0  ;;  %v1862_v50 = vld [vmem:[#allocation3 + $0x10] sm:$0xff] }
 0x18c   : > { %903 = vst.msk [vmem:[#allocation3 + $0x1c] sm:$0xf] %vm642_vm0, %v898_v48  ;;  %986 = vmatpush.bf16.xpose.msrb.mxu3 %v977_v49  ;;  %v1001_v51 = vsel %vm669_vm1, %v1862_v50, 0  ;;  %v1042_v48 = vld [vmem:[#allocation6 + $0x10] sm:$0xff] }
 0x193   : > { %1764 = vmatmul.msk.bf16.vlgmr.msrb.gmra.mxu3 %vm669_vm1, %v914_v54  ;;  %v1863_v55 = vld [vmem:[#allocation3 + $0x18] sm:$0xff] }
 0x194   : > { %1010 = vmatpush.bf16.xpose.msra.mxu3 %v1001_v51  ;;  %v1025_v59 = vsel %vm669_vm1, %v1863_v55, 0 }
 0x195   : > { %1034 = vmatpush.bf16.xpose.msrb.mxu0 %v1025_v59 }
 0x19c   : > { %1774 = vmatmul.msk.bf16.vlgmr.msrb.gmra.mxu0 %vm669_vm1, %v916_v63 }
 0x1a3   : > { %v964_v3 = vpop.f32.mrf.mxu3  ;;  %1769 = vmatmul.msk.bf16.vlgmr.msra.gmra.mxu3 %vm669_vm1, %v915_v2 }
 0x1a4   : > { %v965_v4 = vadd.f32 %v964_v3, %v942_v1 }
 0x1a6   : > { %v1045_v5 = vsel %vm1044_vm6, %v965_v4, -inf }
 0x1a7   : > { %1046 = vmax.xlane.f32.xlu0 %v1045_v5 }
 0x1ab   : > { %v966_v6 = vpop.f32.mrf.mxu3 }
 0x216   : > { %v988_v12 = vpop.f32.mrf.mxu3 }
 0x217   : > { %v2770_v14 = vadd.f32 %v988_v12, %v942_v1 }
 0x219   : > { %v1048_v16 = vsel %vm1044_vm6, %v2770_v14, -inf  ;;  %v1036_v18 = vpop.f32.mrf.mxu0 }
 0x21a   : > { %1049 = vmax.xlane.f32.xlu1 %v1048_v16  ;;  %v1047_v17 = vpop.xlane.xlu0 %1046  ;;  %v2779_v20 = vadd.f32 %v1036_v18, %v942_v1 }
 0x21b   : > { %v2777_v19 = vmax.f32 %v2772_v15, %v1047_v17 }
 0x21c   : > { %v1054_v22 = vsel %vm1044_vm6, %v2779_v20, -inf }
 0x21d   : > { %v1061_v21 = vsub.f32 %v2772_v15, %v2777_v19  ;;  %1270 = vst.msk [vmem:[#allocation6] sm:$0xff] %vm660_vm7, %v2777_v19  ;;  %1075 = vperm.xlu0 %2037, %v2777_v19   ;;  %1055 = vmax.xlane.f32.xlu2 %v1054_v22  ;;  %v1106_v22 = vld [vmem:[#allocation7 + $0x8] sm:$0xff]  ;;  %v1107_v19 = vld [vmem:[#allocation7 + $0x10] sm:$0xff] }
 0x21e   : > { %v990_v23 = vpop.f32.mrf.mxu3 }
 0x221   : > { %v1038_v24 = vpop.f32.mrf.mxu0 }
 0x225   : > { %904 = vrot.lane.b32.xlu0 %v851_v9, %s2419_s4 }
 0x226   : > { %v1012_v25 = vpop.f32.mrf.mxu3 }
 0x227   : > { %v2793_v27 = vadd.f32 %v1012_v25, %v942_v1 }
 0x229   : > { %v1051_v28 = vsel %vm1044_vm6, %v2793_v27, -inf }
 0x22e   : > { %v1014_v26 = vpop.f32.mrf.mxu3 }
 0x233   : > { %868 = vrot.lane.b32.xlu1 %v851_v9, %s2417_s30 }
 0x235   : > { %870 = vrot.lane.b32.xlu2 %v852_v11, %s2417_s30 }
 0x23b   : > { %888 = vrot.lane.b32.xlu1 %v852_v11, %s2418_s6 }
 0x23d   : > { %886 = vrot.lane.b32.xlu2 %v851_v9, %s2418_s6 }
 0x266   : > { %1052 = vmax.xlane.f32.xlu2 %v1051_v28 }
 0x28d   : > { %v1050_v30 = vpop.xlane.xlu1 %1049 }
 0x28e   : > { %v2800_v31 = vmax.f32 %v2797_v29, %v1050_v30 }
 0x28f   : > { %v1076_v32 = vpop.permute.xlu0 %1075 }
 0x290   : > { %v1062_v34 = vsub.f32 %v2797_v29, %v2800_v31  ;;  %1271 = vst.msk [vmem:[#allocation6 + $0x8] sm:$0xff] %vm660_vm7, %v2800_v31  ;;  %v1093_v35 = vsub.f32 %v965_v4, %v1076_v32  ;;  %1080 = vperm.xlu1 %2038, %v2800_v31   ;;  %v1056_v36 = vpop.xlane.xlu2 %1055 }
 0x291   : > { %v1060_v38 = vmax.f32 %v1043_v33, %v1056_v36  ;;  %v1108_v36 = vld [vmem:[#allocation7 + $0x18] sm:$0xff] }
 0x292   : > { %v1097_v37 = vmul.f32 1.442695, %v1093_v35 }
 0x293   : > { %1273 = vst.msk [vmem:[#allocation6 + $0x18] sm:$0xff] %vm660_vm7, %v1060_v38  ;;  %v1064_v61 = vsub.f32 %v1043_v33, %v1060_v38 }
 0x294   : > { %2041 = vpow2.f32 %v1097_v37 }
 0x295   : > { %v1071_v62 = vmul.f32 1.442695, %v1064_v61 }
 0x297   : > { %v905_v39 = vpop.permute.xlu0 %904 }
 0x298   : > { %906 = vrot.lane.b32.xlu1 %v852_v11, %s2419_s4  ;;  %911 = vst.msk [vmem:[#allocation4 + $0x18] sm:$0xf] %vm642_vm0, %v905_v39  ;;  %v871_v40 = vpop.permute.xlu2 %870 }
 0x299   : > { %876 = vst.msk [vmem:[#allocation4 + $0xc] sm:$0xf] %vm642_vm0, %v871_v40 }
 0x29a   : > { %v2042_v41 = vpop.eup %2041 }
 0x29b   : > { %v1162_v42 = vpack.c.bf16 %v2042_v41, %v2042_v41  ;;  %v1113_v60 = vsel %vm1044_vm6, %v2042_v41, 0.0  ;;  %v1136_v41 = vld [vmem:[#allocation8 + $0x10] sm:$0xff] }
 0x29d   : > { %1779 = vmatmul.msk.bf16.vlgmr.msrb.gmra.mxu2 %vm1044_vm6, %v1162_v42  ;;  %v1137_v42 = vld [vmem:[#allocation8 + $0x18] sm:$0xff] }
 0x2a0   : > { %v887_v43 = vpop.permute.xlu2 %886 }
 0x2a1   : > { %893 = vst.msk [vmem:[#allocation4 + $0x10] sm:$0xf] %vm642_vm0, %v887_v43 }
 0x2a5   : > { %v869_v44 = vpop.permute.xlu1 %868 }
 0x2a6   : > { %875 = vst.msk [vmem:[#allocation4 + $0x8] sm:$0xf] %vm642_vm0, %v869_v44 }
 0x2ad   : > { %v889_v45 = vpop.permute.xlu1 %888  ;;  %v1865_v46 = vld [vmem:[#allocation4 + $0x8] sm:$0xff] }
 0x2ae   : > { %894 = vst.msk [vmem:[#allocation4 + $0x14] sm:$0xf] %vm642_vm0, %v889_v45  ;;  %1212 = vmatpush.bf16.msra.mxu2 %v1865_v46 }
 0x2b5   : > { %v1866_v47 = vld [vmem:[#allocation4 + $0x10] sm:$0xff] }
 0x2b6   : > { %1234 = vmatpush.bf16.msrb.mxu3 %v1866_v47 }
 0x2d9   : > { %v1053_v49 = vpop.xlane.xlu2 %1052 }
 0x2da   : > { %v1059_v50 = vmax.f32 %v1042_v48, %v1053_v49 }
 0x2dc   : > { %v1063_v51 = vsub.f32 %v1042_v48, %v1059_v50  ;;  %1272 = vst.msk [vmem:[#allocation6 + $0x10] sm:$0xff] %vm660_vm7, %v1059_v50  ;;  %1085 = vperm.xlu2 %2039, %v1059_v50  }
 0x2de   : > { %v1069_v16 = vmul.f32 1.442695, %v1063_v51 }
 0x2e4   : > { %1090 = vperm.xlu2 %2039, %v1060_v38  }
 0x302   : > { %v1081_v52 = vpop.permute.xlu1 %1080 }
 0x303   : > { %v1094_v53 = vsub.f32 %v2770_v14, %v1081_v52  ;;  %v1067_v14 = vmul.f32 1.442695, %v1062_v34 }
 0x305   : > { %v1099_v54 = vmul.f32 1.442695, %v1094_v53 }
 0x307   : > { %2043 = vpow2.f32 %v1099_v54  ;;  %v1135_v54 = vld [vmem:[#allocation8 + $0x8] sm:$0xff] }
 0x308   : > { %2045 = vpow2.f32 %v1071_v62 }
 0x30a   : > { %v907_v55 = vpop.permute.xlu1 %906 }
 0x30b   : > { %912 = vst.msk [vmem:[#allocation4 + $0x1c] sm:$0xf] %vm642_vm0, %v907_v55 }
 0x30d   : > { %v2044_v56 = vpop.eup %2043 }
 0x30e   : > { %v1163_v57 = vpack.c.bf16 %v2044_v56, %v2044_v56  ;;  %v1116_v58 = vsel %vm1044_vm6, %v2044_v56, 0.0  ;;  %v2046_v1 = vpop.eup %2045 }
 0x30f   : > { %1117 = vadd.xlane.f32.xlu0 %v1116_v58  ;;  %v1112_v37 = vmul.f32 %v2046_v1, %v1108_v36 }
 0x310   : > { %1784 = vmatmul.msk.bf16.vlgmr.msra.gmra.mxu2 %vm1044_vm6, %v1163_v57 }
 0x312   : > { %v1867_v59 = vld [vmem:[#allocation4 + $0x18] sm:$0xff] }
 0x313   : > { %1256 = vmatpush.bf16.msra.mxu0 %v1867_v59 }
 0x317   : > { %1114 = vadd.xlane.f32.xlu0 %v1113_v60 }
 0x320   : > { %v2821_v63 = vpop.f32.mrf.mxu2 }
 0x328   : > { %v1194_v0 = vpop.f32.mrf.mxu2 }
 0x32b   : > { %1155 = vperm.xlu0 %2037, %v2046_v1  }
 0x336   : > { %v1086_v2 = vpop.permute.xlu2 %1085 }
 0x337   : > { %v1095_v3 = vsub.f32 %v2793_v27, %v1086_v2  ;;  %v1105_v27 = vld [vmem:[#allocation7] sm:$0xff] }
 0x339   : > { %v1101_v4 = vmul.f32 1.442695, %v1095_v3  ;;  %v1134_v3 = vld [vmem:[#allocation8] sm:$0xff] }
 0x33b   : > { %2047 = vpow2.f32 %v1101_v4 }
 0x33e   : > { %v1091_v5 = vpop.permute.xlu2 %1090 }
 0x33f   : > { %v1096_v6 = vsub.f32 %v2779_v20, %v1091_v5  ;;  %v1065_v20 = vmul.f32 1.442695, %v1061_v21 }
 0x341   : > { %v2048_v7 = vpop.eup %2047  ;;  %v1103_v8 = vmul.f32 1.442695, %v1096_v6 }
 0x342   : > { %v1164_v9 = vpack.c.bf16 %v2048_v7, %v2048_v7  ;;  %v1119_v10 = vsel %vm1044_vm6, %v2048_v7, 0.0 }
 0x343   : > { %2049 = vpow2.f32 %v1103_v8  ;;  %1120 = vadd.xlane.f32.xlu1 %v1119_v10 }
 0x344   : > { %1789 = vmatmul.msk.bf16.vlgmr.msrb.gmra.mxu3 %vm1044_vm6, %v1164_v9  ;;  %2051 = vpow2.f32 %v1067_v14 }
 0x345   : > { %2053 = vpow2.f32 %v1069_v16 }
 0x346   : > { %2055 = vpow2.f32 %v1065_v20 }
 0x349   : > { %v2050_v11 = vpop.eup %2049 }
 0x34a   : > { %v1165_v12 = vpack.c.bf16 %v2050_v11, %v2050_v11  ;;  %v1122_v13 = vsel %vm1044_vm6, %v2050_v11, 0.0  ;;  %v2052_v17 = vpop.eup %2051 }
 0x34b   : > { %1123 = vadd.xlane.f32.xlu2 %v1122_v13  ;;  %v2054_v18 = vpop.eup %2053  ;;  %v1110_v23 = vmul.f32 %v2052_v17, %v1106_v22  ;;  %v1875_v22 = vld [vmem:[#allocation20 + $0x38] sm:$0xff] }
 0x34c   : > { %1794 = vmatmul.msk.bf16.vlgmr.msra.gmra.mxu0 %vm1044_vm6, %v1165_v12  ;;  %v2056_v26 = vpop.eup %2055  ;;  %v1111_v21 = vmul.f32 %v2054_v18, %v1107_v19  ;;  %1405 = vmatpush.bf16.msrb.mxu1 %v1875_v22 }
 0x34d   : > { %v1109_v28 = vmul.f32 %v2056_v26, %v1105_v27  ;;  %v1870_v27 = vld [vmem:[#allocation20 + $0x10] sm:$0xff] }
 0x35c   : > { %1145 = vperm.xlu1 %2038, %v2052_v17  }
 0x363   : > { %1150 = vperm.xlu2 %2039, %v2054_v18  }
 0x382   : > { %v1118_v24 = vpop.xlane.xlu0 %1117 }
 0x383   : > { %v1126_v25 = vadd.f32 %v1118_v24, %v1110_v23  ;;  %v1873_v24 = vld [vmem:[#allocation20 + $0x28] sm:$0xff] }
 0x385   : > { %1131 = vst.msk [vmem:[#allocation7 + $0x8] sm:$0xff] %vm660_vm7, %v1126_v25  ;;  %v1872_v25 = vld [vmem:[#allocation20 + $0x20] sm:$0xff] }
 0x38a   : > { %v1115_v29 = vpop.xlane.xlu0 %1114 }
 0x38b   : > { %v1125_v30 = vadd.f32 %v1115_v29, %v1109_v28  ;;  %v1869_v28 = vld [vmem:[#allocation20 + $0x8] sm:$0xff]  ;;  %v1868_v29 = vld [vmem:[#allocation20] sm:$0xff] }
 0x38c   : > { %v1278_v31 = vld [vmem:[#allocation7 + $0x8] sm:$0xff] }
 0x38d   : > { %1130 = vst.msk [vmem:[#allocation7] sm:$0xff] %vm660_vm7, %v1125_v30  ;;  %2057 = vrcp.f32 %v1278_v31 }
 0x393   : > { %v2058_v32 = vpop.eup %2057  ;;  %v1214_v33 = vpop.f32.mrf.mxu2 }
 0x394   : > { %1296 = vperm.xlu1 %2038, %v2058_v32   ;;  %v1277_v44 = vld [vmem:[#allocation7] sm:$0xff] }
 0x39b   : > { %v1216_v15 = vpop.f32.mrf.mxu2 }
 0x39c   : > { %1140 = vperm.xlu1 %2038, %v2056_v26   ;;  %v1871_v26 = vld [vmem:[#allocation20 + $0x18] sm:$0xff] }
 0x39d   : > { %v1156_v43 = vpop.permute.xlu0 %1155 }
 0x39e   : > { %v1161_v49 = vmul.f32 %v1156_v43, %v1137_v42 }
 0x3b6   : > { %v1121_v34 = vpop.xlane.xlu1 %1120 }
 0x3b7   : > { %v1127_v35 = vadd.f32 %v1121_v34, %v1111_v21 }
 0x3b9   : > { %1132 = vst.msk [vmem:[#allocation7 + $0x10] sm:$0xff] %vm660_vm7, %v1127_v35 }
 0x3be   : > { %v1124_v38 = vpop.xlane.xlu2 %1123 }
 0x3bf   : > { %v1128_v39 = vadd.f32 %v1124_v38, %v1112_v37 }
 0x3c0   : > { %v1279_v40 = vld [vmem:[#allocation7 + $0x10] sm:$0xff] }
 0x3c1   : > { %1133 = vst.msk [vmem:[#allocation7 + $0x18] sm:$0xff] %vm660_vm7, %v1128_v39  ;;  %2059 = vrcp.f32 %v1279_v40 }
 0x3c2   : > { %2061 = vrcp.f32 %v1277_v44 }
 0x3c6   : > { %v1151_v45 = vpop.permute.xlu2 %1150 }
 0x3c7   : > { %v2060_v46 = vpop.eup %2059  ;;  %v1160_v47 = vmul.f32 %v1151_v45, %v1136_v41  ;;  %v1236_v48 = vpop.f32.mrf.mxu3 }
 0x3c8   : > { %1301 = vperm.xlu0 %2037, %v2060_v46   ;;  %v1280_v50 = vld [vmem:[#allocation7 + $0x18] sm:$0xff]  ;;  %v2062_v55 = vpop.eup %2061 }
 0x3c9   : > { %v1264_v51 = vadd.f32 %v1236_v48, %v1160_v47  ;;  %v1258_v52 = vpop.f32.mrf.mxu0  ;;  %2063 = vrcp.f32 %v1280_v50 }
 0x3ca   : > { %v1265_v53 = vadd.f32 %v1258_v52, %v1161_v49 }
 0x3cb   : > { %1268 = vst.msk [vmem:[#allocation8 + $0x10] sm:$0xff] %vm669_vm1, %v1264_v51 }
 0x3cc   : > { %1269 = vst.msk [vmem:[#allocation8 + $0x18] sm:$0xff] %vm669_vm1, %v1265_v53 }
 0x3ce   : > { %v1146_v56 = vpop.permute.xlu1 %1145 }
 0x3cf   : > { %v2064_v57 = vpop.eup %2063  ;;  %v1159_v58 = vmul.f32 %v1146_v56, %v1135_v54  ;;  %v1238_v59 = vpop.f32.mrf.mxu3 }
 0x3d0   : > { %1306 = vperm.xlu2 %2039, %v2064_v57   ;;  %1291 = vperm.xlu0 %2037, %v2062_v55  }
 0x3d1   : > { %v1263_v60 = vadd.f32 %v1214_v33, %v1159_v58  ;;  %v1260_v61 = vpop.f32.mrf.mxu0 }
 0x3d2   : > { %v1287_v11 = vld [vmem:[#allocation8 + $0x10] sm:$0xff] }
 0x3d3   : > { %1267 = vst.msk [vmem:[#allocation8 + $0x8] sm:$0xff] %vm669_vm1, %v1263_v60  ;;  %v1288_v7 = vld [vmem:[#allocation8 + $0x18] sm:$0xff] }
 0x3da   : > { %v1286_v62 = vld [vmem:[#allocation8 + $0x8] sm:$0xff] }
 0x406   : > { %v1297_v0 = vpop.permute.xlu1 %1296 }
 0x407   : > { %v1310_v1 = vmul.f32 %v1297_v0, %v1286_v62 }
 0x409   : > { %v1315_v2 = vpack.c.bf16 %v1310_v1, %v1310_v1 }
 0x40b   : > { %1317 = vrot.lane.b32.xlu2 %v1315_v2, %s2419_s4  ;;  %s548_s4 = scalar_lea.vmem [#allocation21], %s1649_s16 }
 0x40c   : > { %s1434_s27 = sshll.u32 %s548_s4, 4  ;;  %s1435_s27 = int_to_ptr.vmem [resolvable:$true] %s1434_s27 }
 0x40e   : > { %v1141_v4 = vpop.permute.xlu1 %1140 }
 0x40f   : > { %v1158_v5 = vmul.f32 %v1141_v4, %v1134_v3 }
 0x411   : > { %v1262_v6 = vadd.f32 %v2821_v63, %v1158_v5  ;;  %v1874_v63 = vld [vmem:[#allocation20 + $0x30] sm:$0xff] }
 0x412   : > { %1406 = vmatpush.bf16.msrb.mxu1 %v1874_v63 }
 0x413   : > { %1266 = vst.msk [vmem:[#allocation8] sm:$0xff] %vm669_vm1, %v1262_v6 }
 0x416   : > { %1407 = vmatpush.bf16.msrb.mxu1 %v1873_v24 }
 0x41a   : > { %v1285_v16 = vld [vmem:[#allocation8] sm:$0xff]  ;;  %1408 = vmatpush.bf16.msrb.mxu1 %v1872_v25 }
 0x41e   : > { %1409 = vmatpush.bf16.msrb.mxu1 %v1871_v26 }
 0x422   : > { %1410 = vmatpush.bf16.msrb.mxu1 %v1870_v27 }
 0x426   : > { %1411 = vmatpush.bf16.msrb.mxu1 %v1869_v28 }
 0x42a   : > { %v1307_v8 = vpop.permute.xlu2 %1306  ;;  %1412 = vmatpush.bf16.msrb.mxu1 %v1868_v29 }
 0x42b   : > { %v1312_v9 = vmul.f32 %v1307_v8, %v1288_v7 }
 0x42d   : > { %v1329_v10 = vpack.c.bf16 %v1312_v9, %v1312_v9 }
 0x42f   : > { %1331 = vrot.lane.b32.xlu0 %v1329_v10, %s2417_s30 }
 0x43a   : > { %v1302_v12 = vpop.permute.xlu0 %1301 }
 0x43b   : > { %v1311_v13 = vmul.f32 %v1302_v12, %v1287_v11 }
 0x43d   : > { %v1322_v14 = vpack.c.bf16 %v1311_v13, %v1311_v13 }
 0x43f   : > { %1324 = vrot.lane.b32.xlu1 %v1322_v14, %s2418_s6  ;;  %s2979_s6 = sld [smem:[#allocation44_spill]] }
 0x442   : > { %v1292_v17 = vpop.permute.xlu0 %1291 }
 0x443   : > { %v1309_v18 = vmul.f32 %v1292_v17, %v1285_v16 }
 0x445   : > { %v1313_v20 = vpack.c.bf16 %v1309_v18, %v1309_v18  ;;  %v2040_v33 = vld [vmem:[%s2979_s6] ss:$0 sm:$0xff] }
 0x447   : > { %1314 = vst.msk [vmem:[#allocation5] sm:$0xf] %vm642_vm0, %v1313_v20 }
 0x465   : > { %v1318_v23 = vpop.permute.xlu2 %1317 }
 0x466   : > { %1321 = vst.msk [vmem:[#allocation5] sm:$0xf] %vm1320_vm8, %v1318_v23 }
 0x4a1   : > { %v1332_v31 = vpop.permute.xlu0 %1331 }
 0x4b1   : > { %v1325_v30 = vpop.permute.xlu1 %1324 }
 0x4b2   : > { %1328 = vst.msk [vmem:[#allocation5] sm:$0xf] %vm1327_vm9, %v1325_v30 }
 0x4b3   : > { %1335 = vst.msk [vmem:[#allocation5] sm:$0xf] %vm1334_vm10, %v1332_v31 }
 0x4ba   : > { %v1336_v32 = vld [vmem:[#allocation5] sm:$0xf] }
 0x4bb   : > { %1413 = vmatmul.bf16.vlgmr.msrb.gmra.mxu1 %v1336_v32 }
 0x538   : > { %v1414_v15 = vpop.f32.mrf.mxu1 }
 0x539   : > { %v1415_v19 = vadd.f32 %v2040_v33, %v1414_v15 }
 0x53b   : > { %1418 = vst [vmem:[%s548_s4] sm:$0xff] %v1415_v19 }
 0x53c   : > { %2302 = shalt.err (!%p2299_p8)
}
 0x53d   : > { %1898 = dma.vmem_to_hbm [thread:$0]  (%p2648_p13), %s1435_s27, 128, %s1437_s22, %s1420_s26  }
 0x540   : > { %v1416_v21 = vpop.f32.mrf.mxu1 }
 0x541 PF: > { %s2980_s12 = sld [smem:[#allocation28_spill]]  ;;  %p1936_p11 = scmp.ge.s32.totalorder %s2409_s19, 2 }
 0x543   : > { %p1924_p4 = pnand %p1936_p11, %p2654_p6 }
 0x545   : > { %p1925_p0 = pneg %p1924_p4 }
 0x547   : > { %s1448_s16 = sand.u32 1, %s2980_s12  }
 0x548   : > { %s1449_s24 = scalar_lea.sflag [#allocation11], %s1448_s16 }
 0x549   : > { %2364 = dma.done.wait (%p1925_p0), %s1449_s24, 128  }
 0x54a   : > { %2366 = vsyncadd (%p1925_p0), %s1449_s24, 4294967168  ;;  %s30_s19 = sadd.s32 1, %s2409_s19   ;;  %s2982_s30 = sld [smem:[#allocation27_spill]] }
 0x54b   : > { %p27_p5 = scmp.ge.s32.totalorder %s30_s19, 6   ;;  %s2983_s28 = sld [smem:[#allocation33_spill]] }
 0x54c   : > { %s2984_s3 = sld [smem:[#allocation34_spill]]  ;;  %s2985_s10 = smov %s2377_s11 }
 0x54d   : > { %s2986_s11 = smov %s2662_s5  ;;  %s2987_s12 = smov %s2385_s13 }
 0x54e   : > { %s2988_s13 = smov %s2389_s14  ;;  %s2989_s14 = smov %s2665_s7 }
 0x54f   : > { %s2990_s15 = smov %s2401_s17  ;;  %s2991_s16 = smov %s2405_s18 }
 0x550   :  { %29 = sbr.rel (!%p27_p5) target bundleno = 23 (0x17), region = 161 }
 0x551   : > { %s2992_s17 = smov %s2983_s28 }
 0x552   : > { %s2993_s18 = smov %s2984_s3 }
 0x555   :  { %1455 = vsyncpa [#allocation10], 1 }
 0x556   :  { %1457 = vsyncpa [#allocation10 + $0x1], 1 }
 0x557   :  { %1458 = vsyncpa [#allocation13], 1 }
 0x558   :  { %1460 = vsyncpa [#allocation13 + $0x1], 1 }
 0x559   :  { %1461 = vsyncpa [#allocation16], 1 }
 0x55a   :  { %1462 = vsyncpa [#allocation19], 1 }
 0x55b   :  { %1463 = vsyncpa [#allocation11], 1 }
 0x55c   :  { %1465 = vsyncpa [#allocation11 + $0x1], 1 }

</bundles_post_ra>
